<compile_context>
chip_gen: v7x
topology: tpu7x:2x2x1
jax: 0.10.0
libtpu: 0.0.40
codegen_flags: <defaults>
</compile_context>

<pallas_src>
import numpy as np

import jax
import jax.numpy as jnp
from jax.experimental import pallas as pl
from jax.experimental.pallas import tpu as pltpu


NUM_STAGES = 4  # PSPModule(sizes=(1, 2, 4, 8)) -> len(sizes) pyramid stages


# --------------------------------------------------------------------------
# Host-side (trace-time) operator construction — all static, tiny.
# --------------------------------------------------------------------------

def _pool_sizes(n, num_stages):
    sizes = [n]
    for _ in range(num_stages):
        sizes.append((sizes[-1] - 1) // 2 + 1)
    return sizes


def _avg_pool_matrix(n_in):
    """3-tap / stride-2 / pad-1 averaging matrix (count_include_pad=True)."""
    n_out = (n_in - 1) // 2 + 1
    m = np.zeros((n_out, n_in), np.float32)
    for o in range(n_out):
        for d in (-1, 0, 1):
            i = 2 * o + d
            if 0 <= i < n_in:
                m[o, i] += 1.0 / 3.0
    return m


def _bilinear_matrix(n_out, n_in):
    """align_corners=True bilinear interpolation matrix (n_out, n_in).

    The reference PSPModule explicitly uses F.interpolate(..., mode='bilinear',
    align_corners=True), which this matches.
    """
    m = np.zeros((n_out, n_in), np.float32)
    if n_in == 1:
        m[:, 0] = 1.0
        return m
    scale = 0.0 if n_out == 1 else (n_in - 1) / (n_out - 1)
    for o in range(n_out):
        src = o * scale
        i0 = min(max(int(np.floor(src)), 0), n_in - 1)
        i1 = min(i0 + 1, n_in - 1)
        f = src - i0
        m[o, i0] += 1.0 - f
        m[o, i1] += f
    return m


def _shift_cols(m, d):
    """Column-shifted copy: out[:, k] = m[:, k - d], zero where out of range.

    Folds a +/-1 depthwise-conv tap offset (with zero padding at the borders)
    into the upsample operator.
    """
    out = np.zeros_like(m)
    n = m.shape[1]
    if d == 0:
        out[:] = m
    elif d > 0:
        out[:, d:] = m[:, : n - d]
    else:
        out[:, : n + d] = m[:, -d:]
    return out


def _round_up8(n):
    return max(8, ((n + 7) // 8) * 8)


def _build_operators(H, W, h_sizes, w_sizes, num_stages):
    """Per-stage Kronecker operators on row-major-flattened spatial maps.

    pool_ops[s]: (P[s], P[s+1])        pooled = cur @ pool_ops[s]
    up_ops[s]  : (9, P[s+1], H*W)      up += w_tap * (pooled @ up_ops[s][tap])
    Spatial sizes are zero-padded to multiples of 8 (exactness preserved:
    padded rows/columns are zero).
    """
    HW = H * W
    psz = [HW] + [_round_up8(h_sizes[s] * w_sizes[s]) for s in range(1, num_stages + 1)]
    pool_ops, up_ops = [], []
    for s in range(num_stages):
        hi, ho = h_sizes[s], h_sizes[s + 1]
        wi, wo = w_sizes[s], w_sizes[s + 1]

        ph = _avg_pool_matrix(hi)                       # (ho, hi)
        pw = _avg_pool_matrix(wi)                       # (wo, wi)
        pool_t = np.zeros((psz[s], psz[s + 1]), np.float32)
        pool_t[: hi * wi, : ho * wo] = np.kron(ph, pw).T
        pool_ops.append(jnp.asarray(pool_t))

        uh = _bilinear_matrix(H, ho)                    # (H, ho)
        uw = _bilinear_matrix(W, wo)                    # (W, wo)
        up_t = np.zeros((9, psz[s + 1], HW), np.float32)
        for a in range(3):                              # conv kernel row
            uh_a = _shift_cols(uh, a - 1)
            for b in range(3):                          # conv kernel col
                uw_b = _shift_cols(uw, b - 1)
                up_t[3 * a + b, : ho * wo, :] = np.kron(uh_a, uw_b).T
        up_ops.append(jnp.asarray(up_t))
    return pool_ops, up_ops


def _pick_block(total, max_block):
    """Largest multiple-of-8 divisor of `total` that is <= max_block, preferring
    a choice that leaves >= 2 grid steps (v7x has 2 TensorCores sharded over
    the 'parallel' grid axis; a single-step grid would idle one of them)."""
    divs = [d for d in range(8, total + 1, 8) if total % d == 0 and d <= max_block]
    if not divs:
        return total
    multi = [d for d in divs if total // d >= 2]
    return max(multi) if multi else max(divs)


# --------------------------------------------------------------------------
# Pallas kernel 1: fused pyramid (avg-pool -> depthwise 3x3 -> bilinear up)
# for all 4 stages.  Rows are (channel, batch) pairs, spatial is a flattened
# lane-dense H*W axis, every spatial op is one plain 2-D MXU matmul.
# --------------------------------------------------------------------------

def _pyramid_call(xc, wt, pool_ops, up_ops, num_stages, HW, blk):
    rows = xc.shape[0]

    def kernel(x_ref, wt_ref, *refs):
        pool_refs = refs[:num_stages]
        up_refs = refs[num_stages:2 * num_stages]
        out_ref = refs[2 * num_stages]

        wt_v = wt_ref[...]                              # (blk, S*9), hoisted
        cur = x_ref[...]                                # (blk, H*W) f32
        for s in range(num_stages):
            # ---- 3x3 / stride-2 / pad-1 avg pool (one matmul) ----
            pooled = jnp.dot(cur, pool_refs[s][...],
                             preferred_element_type=jnp.float32)
            # ---- depthwise 3x3 conv fused with bilinear upsample ----
            # 9 taps; each is a per-row (per-channel) scale + one matmul with
            # a shifted-upsample operator (halo handled on the host).
            up = None
            for tap in range(9):
                w_col = wt_v[:, s * 9 + tap: s * 9 + tap + 1]   # (blk, 1)
                term = jnp.dot(pooled * w_col, up_refs[s][tap],
                               preferred_element_type=jnp.float32)
                up = term if up is None else up + term
            out_ref[s] = up.astype(out_ref.dtype)       # lane-dense (blk, H*W)
            cur = pooled

    in_specs = [
        pl.BlockSpec((blk, HW), lambda b: (b, 0)),
        pl.BlockSpec((blk, wt.shape[1]), lambda b: (b, 0)),
    ]
    for op in pool_ops:
        in_specs.append(pl.BlockSpec(op.shape, lambda b: (0, 0)))
    for op in up_ops:
        in_specs.append(pl.BlockSpec(op.shape, lambda b: (0, 0, 0)))

    return pl.pallas_call(
        kernel,
        out_shape=jax.ShapeDtypeStruct((num_stages, rows, HW), jnp.bfloat16),
        grid=(rows // blk,),
        in_specs=in_specs,
        out_specs=pl.BlockSpec((num_stages, blk, HW), lambda b: (0, b, 0)),
        compiler_params=pltpu.CompilerParams(
            dimension_semantics=("parallel",)),
    )(xc, wt, *pool_ops, *up_ops)


# --------------------------------------------------------------------------
# Pallas kernel 2: fused transposed 1x1 projection (bf16 MXU operands, f32
# accumulation) + BatchNorm(batch stats) + per-channel PReLU.  Grid over
# output channels; (Cout, N*H*W) output is lane-dense and the 5-branch concat
# never touches HBM (x and the pyramid output enter as separate operands).
# --------------------------------------------------------------------------

def _project_kernel(wx_ref, wu_ref, xt_ref, upt_ref, g_ref, b_ref, a_ref, o_ref):
    y = jnp.dot(wx_ref[...], xt_ref[...], preferred_element_type=jnp.float32)
    y = y + jnp.dot(wu_ref[...], upt_ref[...], preferred_element_type=jnp.float32)
    # BatchNorm2d with batch statistics (training-mode default after init).
    # Each channel block sees the full N*H*W extent, so the stats are exact.
    # One-pass variance E[y^2] - mean^2, rsqrt on the EUP.
    mean = jnp.mean(y, axis=1, keepdims=True)
    var = jnp.maximum(jnp.mean(y * y, axis=1, keepdims=True) - mean * mean, 0.0)
    y = (y - mean) * jax.lax.rsqrt(var + 1e-5)
    y = y * g_ref[...] + b_ref[...]
    # per-channel PReLU
    o_ref[...] = jnp.where(y >= 0.0, y, a_ref[...] * y).astype(o_ref.dtype)


def _project_call(wx, wu, xt, upt, gamma, beta, alpha, cblk):
    cout, c_in = wx.shape
    c_up = wu.shape[1]
    m = xt.shape[1]
    return pl.pallas_call(
        _project_kernel,
        out_shape=jax.ShapeDtypeStruct((cout, m), jnp.float32),
        grid=(cout // cblk,),
        in_specs=[
            pl.BlockSpec((cblk, c_in), lambda i: (i, 0)),
            pl.BlockSpec((cblk, c_up), lambda i: (i, 0)),
            pl.BlockSpec((c_in, m), lambda i: (0, 0)),
            pl.BlockSpec((c_up, m), lambda i: (0, 0)),
            pl.BlockSpec((cblk, 1), lambda i: (i, 0)),
            pl.BlockSpec((cblk, 1), lambda i: (i, 0)),
            pl.BlockSpec((cblk, 1), lambda i: (i, 0)),
        ],
        out_specs=pl.BlockSpec((cblk, m), lambda i: (i, 0)),
        compiler_params=pltpu.CompilerParams(
            dimension_semantics=("parallel",),
            vmem_limit_bytes=32 * 1024 * 1024),
    )(wx, wu, xt, upt, gamma, beta, alpha)


# --------------------------------------------------------------------------
# Forward pass (PSPModule semantics)
# --------------------------------------------------------------------------

def psp_forward(feats_nchw, params):
    N, C, H, W = feats_nchw.shape
    S = NUM_STAGES
    HW = H * W

    h_sizes = _pool_sizes(H, S)
    w_sizes = _pool_sizes(W, S)
    pool_ops, up_ops = _build_operators(H, W, h_sizes, w_sizes, S)

    # Channel-major row map, rows ordered (c, n), lane-dense flattened H*W.
    x_cn = jnp.transpose(feats_nchw, (1, 0, 2, 3))           # (C, N, H, W)
    xc = x_cn.reshape(C * N, HW)                             # (C*N, H*W) f32

    # Depthwise weights (S, C, 3, 3) -> flat per-row tap table (C*N, S*9).
    wt = params["stage_w"].reshape(S, C, 9)                  # tap = 3*a + b
    wt = jnp.transpose(wt, (1, 0, 2)).reshape(C, S * 9)
    wt = jnp.repeat(wt, N, axis=0)                           # (C*N, S*9)

    rows = C * N
    blk = _pick_block(rows, 512)
    up = _pyramid_call(xc, wt, pool_ops, up_ops, S, HW, blk)  # (S, C*N, HW) bf16

    # Fused transposed 1x1 conv + BN(batch stats) + PReLU.
    m = N * HW
    xt = x_cn.reshape(C, m).astype(jnp.bfloat16)             # pure reshape + cast
    upt = up.reshape(S * C, m)                               # pure reshape (bf16)
    wx = params["proj_w"][:, :C].astype(jnp.bfloat16)
    wu = params["proj_w"][:, C:].astype(jnp.bfloat16)
    cout = params["proj_w"].shape[0]
    cblk = _pick_block(cout, 256)
    yt = _project_call(wx, wu, xt, upt,
                       params["bn_gamma"], params["bn_beta"],
                       params["prelu_a"], cblk)              # (Cout, N*H*W) f32
    return jnp.transpose(yt.reshape(cout, N, H, W), (1, 0, 2, 3))  # NCHW


# --------------------------------------------------------------------------
# Parameter setup (matches the PyTorch module layouts at init)
# --------------------------------------------------------------------------

def init_params(key, features, out_features, num_stages=NUM_STAGES):
    k1, k2 = jax.random.split(key)
    # C(features, features, 3, groups=features): Conv2d weight (C, 1, 3, 3)
    stage_w = jax.random.normal(
        k1, (num_stages, features, 3, 3), jnp.float32) * 0.1
    # CBR 1x1: Conv2d(5C, Cout, 1, bias=False) weight (Cout, 5C)
    proj_w = jax.random.normal(
        k2, (out_features, features * (num_stages + 1)), jnp.float32) * 0.05
    gamma = jnp.ones((out_features, 1), jnp.float32)          # BN weight init
    beta = jnp.zeros((out_features, 1), jnp.float32)          # BN bias init
    alpha = jnp.full((out_features, 1), 0.25, jnp.float32)    # PReLU(nOut) init
    return {"stage_w": stage_w, "proj_w": proj_w,
            "bn_gamma": gamma, "bn_beta": beta, "prelu_a": alpha}


# --------------------------------------------------------------------------
# main
# --------------------------------------------------------------------------

if __name__ == "__main__":
    key = jax.random.PRNGKey(0)
    kx, kp = jax.random.split(key)

    N, C, H, W = 2, 8, 16, 16          # PSPModule features = 8
    out_features = 32

    feats = jax.random.normal(kx, (N, C, H, W), jnp.float32)
    params = init_params(kp, C, out_features)

    fwd = jax.jit(psp_forward)
    y = jax.block_until_ready(fwd(feats, params))

    assert y.shape == (N, out_features, H, W), y.shape
    assert bool(jnp.all(jnp.isfinite(y)))
    print("KERNEL_OK")
</pallas_src>

<mosaic_0001>
module attributes {stable_mosaic.version = 11 : i64} {
  func.func @kernel(%arg0: i32, %arg1: memref<8x256xf32, #tpu.memory_space<vmem>>, %arg2: memref<8x36xf32, #tpu.memory_space<vmem>>, %arg3: memref<256x64xf32, #tpu.memory_space<vmem>>, %arg4: memref<64x16xf32, #tpu.memory_space<vmem>>, %arg5: memref<16x8xf32, #tpu.memory_space<vmem>>, %arg6: memref<8x8xf32, #tpu.memory_space<vmem>>, %arg7: memref<9x64x256xf32, #tpu.memory_space<vmem>>, %arg8: memref<9x16x256xf32, #tpu.memory_space<vmem>>, %arg9: memref<9x8x256xf32, #tpu.memory_space<vmem>>, %arg10: memref<9x8x256xf32, #tpu.memory_space<vmem>>, %arg11: memref<4x8x256xbf16, #tpu.memory_space<vmem>>) attributes {dimension_semantics = [#tpu.dimension_semantics<parallel>], iteration_bounds = array<i64: 2>, scalar_prefetch = 0 : i64, scratch_operands = 0 : i64, tpu.core_type = #tpu.core_type<tc>, window_params = [{transform_indices = @transform_0, window_bounds = array<i64: 8, 256>}, {transform_indices = @transform_1, window_bounds = array<i64: 8, 36>}, {pipeline_mode = #tpu.pipeline_mode<synchronous>, transform_indices = @transform_2, window_bounds = array<i64: 256, 64>}, {pipeline_mode = #tpu.pipeline_mode<synchronous>, transform_indices = @transform_3, window_bounds = array<i64: 64, 16>}, {pipeline_mode = #tpu.pipeline_mode<synchronous>, transform_indices = @transform_4, window_bounds = array<i64: 16, 8>}, {pipeline_mode = #tpu.pipeline_mode<synchronous>, transform_indices = @transform_5, window_bounds = array<i64: 8, 8>}, {pipeline_mode = #tpu.pipeline_mode<synchronous>, transform_indices = @transform_6, window_bounds = array<i64: 9, 64, 256>}, {pipeline_mode = #tpu.pipeline_mode<synchronous>, transform_indices = @transform_7, window_bounds = array<i64: 9, 16, 256>}, {pipeline_mode = #tpu.pipeline_mode<synchronous>, transform_indices = @transform_8, window_bounds = array<i64: 9, 8, 256>}, {pipeline_mode = #tpu.pipeline_mode<synchronous>, transform_indices = @transform_9, window_bounds = array<i64: 9, 8, 256>}, {transform_indices = @transform_10, window_bounds = array<i64: 4, 8, 256>}]} {
    %c0 = arith.constant 0 : index
    %c0_0 = arith.constant 0 : index
    %0 = vector.load %arg2[%c0, %c0_0] : memref<8x36xf32, #tpu.memory_space<vmem>>, vector<8x36xf32>
    %c0_1 = arith.constant 0 : index
    %c0_2 = arith.constant 0 : index
    %1 = vector.load %arg1[%c0_1, %c0_2] : memref<8x256xf32, #tpu.memory_space<vmem>>, vector<8x256xf32>
    %c0_3 = arith.constant 0 : index
    %c0_4 = arith.constant 0 : index
    %2 = vector.load %arg3[%c0_3, %c0_4] : memref<256x64xf32, #tpu.memory_space<vmem>>, vector<256x64xf32>
    %cst = arith.constant dense<0.000000e+00> : vector<8x64xf32>
    %3 = tpu.matmul %1, %2, %cst {dimension_numbers = #tpu.dot_dimension_numbers<[1], [0], [0], [1], [0, 0, 1, 1], [], []>} : vector<8x256xf32>, vector<256x64xf32>, vector<8x64xf32> -> vector<8x64xf32>
    %4 = vector.extract_strided_slice %0 {offsets = [0, 0], sizes = [8, 1], strides = [1, 1]} : vector<8x36xf32> to vector<8x1xf32>
    %5 = vector.broadcast %4 : vector<8x1xf32> to vector<8x64xf32>
    %6 = arith.mulf %3, %5 : vector<8x64xf32>
    %c0_5 = arith.constant 0 : index
    %c0_6 = arith.constant 0 : index
    %c0_7 = arith.constant 0 : index
    %7 = vector.load %arg7[%c0_5, %c0_6, %c0_7] : memref<9x64x256xf32, #tpu.memory_space<vmem>>, vector<1x64x256xf32>
    %8 = vector.shape_cast %7 : vector<1x64x256xf32> to vector<64x256xf32>
    %cst_8 = arith.constant dense<0.000000e+00> : vector<8x256xf32>
    %9 = tpu.matmul %6, %8, %cst_8 {dimension_numbers = #tpu.dot_dimension_numbers<[1], [0], [0], [1], [0, 0, 1, 1], [], []>} : vector<8x64xf32>, vector<64x256xf32>, vector<8x256xf32> -> vector<8x256xf32>
    %10 = vector.extract_strided_slice %0 {offsets = [0, 1], sizes = [8, 1], strides = [1, 1]} : vector<8x36xf32> to vector<8x1xf32>
    %11 = vector.broadcast %10 : vector<8x1xf32> to vector<8x64xf32>
    %12 = arith.mulf %3, %11 : vector<8x64xf32>
    %c1 = arith.constant 1 : index
    %c0_9 = arith.constant 0 : index
    %c0_10 = arith.constant 0 : index
    %13 = vector.load %arg7[%c1, %c0_9, %c0_10] : memref<9x64x256xf32, #tpu.memory_space<vmem>>, vector<1x64x256xf32>
    %14 = vector.shape_cast %13 : vector<1x64x256xf32> to vector<64x256xf32>
    %cst_11 = arith.constant dense<0.000000e+00> : vector<8x256xf32>
    %15 = tpu.matmul %12, %14, %cst_11 {dimension_numbers = #tpu.dot_dimension_numbers<[1], [0], [0], [1], [0, 0, 1, 1], [], []>} : vector<8x64xf32>, vector<64x256xf32>, vector<8x256xf32> -> vector<8x256xf32>
    %16 = arith.addf %9, %15 : vector<8x256xf32>
    %17 = vector.extract_strided_slice %0 {offsets = [0, 2], sizes = [8, 1], strides = [1, 1]} : vector<8x36xf32> to vector<8x1xf32>
    %18 = vector.broadcast %17 : vector<8x1xf32> to vector<8x64xf32>
    %19 = arith.mulf %3, %18 : vector<8x64xf32>
    %c2 = arith.constant 2 : index
    %c0_12 = arith.constant 0 : index
    %c0_13 = arith.constant 0 : index
    %20 = vector.load %arg7[%c2, %c0_12, %c0_13] : memref<9x64x256xf32, #tpu.memory_space<vmem>>, vector<1x64x256xf32>
    %21 = vector.shape_cast %20 : vector<1x64x256xf32> to vector<64x256xf32>
    %cst_14 = arith.constant dense<0.000000e+00> : vector<8x256xf32>
    %22 = tpu.matmul %19, %21, %cst_14 {dimension_numbers = #tpu.dot_dimension_numbers<[1], [0], [0], [1], [0, 0, 1, 1], [], []>} : vector<8x64xf32>, vector<64x256xf32>, vector<8x256xf32> -> vector<8x256xf32>
    %23 = arith.addf %16, %22 : vector<8x256xf32>
    %24 = vector.extract_strided_slice %0 {offsets = [0, 3], sizes = [8, 1], strides = [1, 1]} : vector<8x36xf32> to vector<8x1xf32>
    %25 = vector.broadcast %24 : vector<8x1xf32> to vector<8x64xf32>
    %26 = arith.mulf %3, %25 : vector<8x64xf32>
    %c3 = arith.constant 3 : index
    %c0_15 = arith.constant 0 : index
    %c0_16 = arith.constant 0 : index
    %27 = vector.load %arg7[%c3, %c0_15, %c0_16] : memref<9x64x256xf32, #tpu.memory_space<vmem>>, vector<1x64x256xf32>
    %28 = vector.shape_cast %27 : vector<1x64x256xf32> to vector<64x256xf32>
    %cst_17 = arith.constant dense<0.000000e+00> : vector<8x256xf32>
    %29 = tpu.matmul %26, %28, %cst_17 {dimension_numbers = #tpu.dot_dimension_numbers<[1], [0], [0], [1], [0, 0, 1, 1], [], []>} : vector<8x64xf32>, vector<64x256xf32>, vector<8x256xf32> -> vector<8x256xf32>
    %30 = arith.addf %23, %29 : vector<8x256xf32>
    %31 = vector.extract_strided_slice %0 {offsets = [0, 4], sizes = [8, 1], strides = [1, 1]} : vector<8x36xf32> to vector<8x1xf32>
    %32 = vector.broadcast %31 : vector<8x1xf32> to vector<8x64xf32>
    %33 = arith.mulf %3, %32 : vector<8x64xf32>
    %c4 = arith.constant 4 : index
    %c0_18 = arith.constant 0 : index
    %c0_19 = arith.constant 0 : index
    %34 = vector.load %arg7[%c4, %c0_18, %c0_19] : memref<9x64x256xf32, #tpu.memory_space<vmem>>, vector<1x64x256xf32>
    %35 = vector.shape_cast %34 : vector<1x64x256xf32> to vector<64x256xf32>
    %cst_20 = arith.constant dense<0.000000e+00> : vector<8x256xf32>
    %36 = tpu.matmul %33, %35, %cst_20 {dimension_numbers = #tpu.dot_dimension_numbers<[1], [0], [0], [1], [0, 0, 1, 1], [], []>} : vector<8x64xf32>, vector<64x256xf32>, vector<8x256xf32> -> vector<8x256xf32>
    %37 = arith.addf %30, %36 : vector<8x256xf32>
    %38 = vector.extract_strided_slice %0 {offsets = [0, 5], sizes = [8, 1], strides = [1, 1]} : vector<8x36xf32> to vector<8x1xf32>
    %39 = vector.broadcast %38 : vector<8x1xf32> to vector<8x64xf32>
    %40 = arith.mulf %3, %39 : vector<8x64xf32>
    %c5 = arith.constant 5 : index
    %c0_21 = arith.constant 0 : index
    %c0_22 = arith.constant 0 : index
    %41 = vector.load %arg7[%c5, %c0_21, %c0_22] : memref<9x64x256xf32, #tpu.memory_space<vmem>>, vector<1x64x256xf32>
    %42 = vector.shape_cast %41 : vector<1x64x256xf32> to vector<64x256xf32>
    %cst_23 = arith.constant dense<0.000000e+00> : vector<8x256xf32>
    %43 = tpu.matmul %40, %42, %cst_23 {dimension_numbers = #tpu.dot_dimension_numbers<[1], [0], [0], [1], [0, 0, 1, 1], [], []>} : vector<8x64xf32>, vector<64x256xf32>, vector<8x256xf32> -> vector<8x256xf32>
    %44 = arith.addf %37, %43 : vector<8x256xf32>
    %45 = vector.extract_strided_slice %0 {offsets = [0, 6], sizes = [8, 1], strides = [1, 1]} : vector<8x36xf32> to vector<8x1xf32>
    %46 = vector.broadcast %45 : vector<8x1xf32> to vector<8x64xf32>
    %47 = arith.mulf %3, %46 : vector<8x64xf32>
    %c6 = arith.constant 6 : index
    %c0_24 = arith.constant 0 : index
    %c0_25 = arith.constant 0 : index
    %48 = vector.load %arg7[%c6, %c0_24, %c0_25] : memref<9x64x256xf32, #tpu.memory_space<vmem>>, vector<1x64x256xf32>
    %49 = vector.shape_cast %48 : vector<1x64x256xf32> to vector<64x256xf32>
    %cst_26 = arith.constant dense<0.000000e+00> : vector<8x256xf32>
    %50 = tpu.matmul %47, %49, %cst_26 {dimension_numbers = #tpu.dot_dimension_numbers<[1], [0], [0], [1], [0, 0, 1, 1], [], []>} : vector<8x64xf32>, vector<64x256xf32>, vector<8x256xf32> -> vector<8x256xf32>
    %51 = arith.addf %44, %50 : vector<8x256xf32>
    %52 = vector.extract_strided_slice %0 {offsets = [0, 7], sizes = [8, 1], strides = [1, 1]} : vector<8x36xf32> to vector<8x1xf32>
    %53 = vector.broadcast %52 : vector<8x1xf32> to vector<8x64xf32>
    %54 = arith.mulf %3, %53 : vector<8x64xf32>
    %c7 = arith.constant 7 : index
    %c0_27 = arith.constant 0 : index
    %c0_28 = arith.constant 0 : index
    %55 = vector.load %arg7[%c7, %c0_27, %c0_28] : memref<9x64x256xf32, #tpu.memory_space<vmem>>, vector<1x64x256xf32>
    %56 = vector.shape_cast %55 : vector<1x64x256xf32> to vector<64x256xf32>
    %cst_29 = arith.constant dense<0.000000e+00> : vector<8x256xf32>
    %57 = tpu.matmul %54, %56, %cst_29 {dimension_numbers = #tpu.dot_dimension_numbers<[1], [0], [0], [1], [0, 0, 1, 1], [], []>} : vector<8x64xf32>, vector<64x256xf32>, vector<8x256xf32> -> vector<8x256xf32>
    %58 = arith.addf %51, %57 : vector<8x256xf32>
    %59 = vector.extract_strided_slice %0 {offsets = [0, 8], sizes = [8, 1], strides = [1, 1]} : vector<8x36xf32> to vector<8x1xf32>
    %60 = vector.broadcast %59 : vector<8x1xf32> to vector<8x64xf32>
    %61 = arith.mulf %3, %60 : vector<8x64xf32>
    %c8 = arith.constant 8 : index
    %c0_30 = arith.constant 0 : index
    %c0_31 = arith.constant 0 : index
    %62 = vector.load %arg7[%c8, %c0_30, %c0_31] : memref<9x64x256xf32, #tpu.memory_space<vmem>>, vector<1x64x256xf32>
    %63 = vector.shape_cast %62 : vector<1x64x256xf32> to vector<64x256xf32>
    %cst_32 = arith.constant dense<0.000000e+00> : vector<8x256xf32>
    %64 = tpu.matmul %61, %63, %cst_32 {dimension_numbers = #tpu.dot_dimension_numbers<[1], [0], [0], [1], [0, 0, 1, 1], [], []>} : vector<8x64xf32>, vector<64x256xf32>, vector<8x256xf32> -> vector<8x256xf32>
    %65 = arith.addf %58, %64 : vector<8x256xf32>
    %66 = arith.truncf %65 : vector<8x256xf32> to vector<8x256xbf16>
    %c0_33 = arith.constant 0 : index
    %c0_34 = arith.constant 0 : index
    %c0_35 = arith.constant 0 : index
    %67 = vector.load %arg11[%c0_33, %c0_34, %c0_35] : memref<4x8x256xbf16, #tpu.memory_space<vmem>>, vector<1x8x256xbf16>
    %68 = vector.shape_cast %67 : vector<1x8x256xbf16> to vector<8x256xbf16>
    %69 = vector.shape_cast %66 : vector<8x256xbf16> to vector<1x8x256xbf16>
    tpu.vector_store %arg11[%c0_33, %c0_34, %c0_35], %69 {strides = array<i32>} : memref<4x8x256xbf16, #tpu.memory_space<vmem>>, vector<1x8x256xbf16>,
    %c0_36 = arith.constant 0 : index
    %c0_37 = arith.constant 0 : index
    %70 = vector.load %arg4[%c0_36, %c0_37] : memref<64x16xf32, #tpu.memory_space<vmem>>, vector<64x16xf32>
    %cst_38 = arith.constant dense<0.000000e+00> : vector<8x16xf32>
    %71 = tpu.matmul %3, %70, %cst_38 {dimension_numbers = #tpu.dot_dimension_numbers<[1], [0], [0], [1], [0, 0, 1, 1], [], []>} : vector<8x64xf32>, vector<64x16xf32>, vector<8x16xf32> -> vector<8x16xf32>
    %72 = vector.extract_strided_slice %0 {offsets = [0, 9], sizes = [8, 1], strides = [1, 1]} : vector<8x36xf32> to vector<8x1xf32>
    %73 = vector.broadcast %72 : vector<8x1xf32> to vector<8x16xf32>
    %74 = arith.mulf %71, %73 : vector<8x16xf32>
    %c0_39 = arith.constant 0 : index
    %c0_40 = arith.constant 0 : index
    %c0_41 = arith.constant 0 : index
    %75 = vector.load %arg8[%c0_39, %c0_40, %c0_41] : memref<9x16x256xf32, #tpu.memory_space<vmem>>, vector<1x16x256xf32>
    %76 = vector.shape_cast %75 : vector<1x16x256xf32> to vector<16x256xf32>
    %cst_42 = arith.constant dense<0.000000e+00> : vector<8x256xf32>
    %77 = tpu.matmul %74, %76, %cst_42 {dimension_numbers = #tpu.dot_dimension_numbers<[1], [0], [0], [1], [0, 0, 1, 1], [], []>} : vector<8x16xf32>, vector<16x256xf32>, vector<8x256xf32> -> vector<8x256xf32>
    %78 = vector.extract_strided_slice %0 {offsets = [0, 10], sizes = [8, 1], strides = [1, 1]} : vector<8x36xf32> to vector<8x1xf32>
    %79 = vector.broadcast %78 : vector<8x1xf32> to vector<8x16xf32>
    %80 = arith.mulf %71, %79 : vector<8x16xf32>
    %c1_43 = arith.constant 1 : index
    %c0_44 = arith.constant 0 : index
    %c0_45 = arith.constant 0 : index
    %81 = vector.load %arg8[%c1_43, %c0_44, %c0_45] : memref<9x16x256xf32, #tpu.memory_space<vmem>>, vector<1x16x256xf32>
    %82 = vector.shape_cast %81 : vector<1x16x256xf32> to vector<16x256xf32>
    %cst_46 = arith.constant dense<0.000000e+00> : vector<8x256xf32>
    %83 = tpu.matmul %80, %82, %cst_46 {dimension_numbers = #tpu.dot_dimension_numbers<[1], [0], [0], [1], [0, 0, 1, 1], [], []>} : vector<8x16xf32>, vector<16x256xf32>, vector<8x256xf32> -> vector<8x256xf32>
    %84 = arith.addf %77, %83 : vector<8x256xf32>
    %85 = vector.extract_strided_slice %0 {offsets = [0, 11], sizes = [8, 1], strides = [1, 1]} : vector<8x36xf32> to vector<8x1xf32>
    %86 = vector.broadcast %85 : vector<8x1xf32> to vector<8x16xf32>
    %87 = arith.mulf %71, %86 : vector<8x16xf32>
    %c2_47 = arith.constant 2 : index
    %c0_48 = arith.constant 0 : index
    %c0_49 = arith.constant 0 : index
    %88 = vector.load %arg8[%c2_47, %c0_48, %c0_49] : memref<9x16x256xf32, #tpu.memory_space<vmem>>, vector<1x16x256xf32>
    %89 = vector.shape_cast %88 : vector<1x16x256xf32> to vector<16x256xf32>
    %cst_50 = arith.constant dense<0.000000e+00> : vector<8x256xf32>
    %90 = tpu.matmul %87, %89, %cst_50 {dimension_numbers = #tpu.dot_dimension_numbers<[1], [0], [0], [1], [0, 0, 1, 1], [], []>} : vector<8x16xf32>, vector<16x256xf32>, vector<8x256xf32> -> vector<8x256xf32>
    %91 = arith.addf %84, %90 : vector<8x256xf32>
    %92 = vector.extract_strided_slice %0 {offsets = [0, 12], sizes = [8, 1], strides = [1, 1]} : vector<8x36xf32> to vector<8x1xf32>
    %93 = vector.broadcast %92 : vector<8x1xf32> to vector<8x16xf32>
    %94 = arith.mulf %71, %93 : vector<8x16xf32>
    %c3_51 = arith.constant 3 : index
    %c0_52 = arith.constant 0 : index
    %c0_53 = arith.constant 0 : index
    %95 = vector.load %arg8[%c3_51, %c0_52, %c0_53] : memref<9x16x256xf32, #tpu.memory_space<vmem>>, vector<1x16x256xf32>
    %96 = vector.shape_cast %95 : vector<1x16x256xf32> to vector<16x256xf32>
    %cst_54 = arith.constant dense<0.000000e+00> : vector<8x256xf32>
    %97 = tpu.matmul %94, %96, %cst_54 {dimension_numbers = #tpu.dot_dimension_numbers<[1], [0], [0], [1], [0, 0, 1, 1], [], []>} : vector<8x16xf32>, vector<16x256xf32>, vector<8x256xf32> -> vector<8x256xf32>
    %98 = arith.addf %91, %97 : vector<8x256xf32>
    %99 = vector.extract_strided_slice %0 {offsets = [0, 13], sizes = [8, 1], strides = [1, 1]} : vector<8x36xf32> to vector<8x1xf32>
    %100 = vector.broadcast %99 : vector<8x1xf32> to vector<8x16xf32>
    %101 = arith.mulf %71, %100 : vector<8x16xf32>
    %c4_55 = arith.constant 4 : index
    %c0_56 = arith.constant 0 : index
    %c0_57 = arith.constant 0 : index
    %102 = vector.load %arg8[%c4_55, %c0_56, %c0_57] : memref<9x16x256xf32, #tpu.memory_space<vmem>>, vector<1x16x256xf32>
    %103 = vector.shape_cast %102 : vector<1x16x256xf32> to vector<16x256xf32>
    %cst_58 = arith.constant dense<0.000000e+00> : vector<8x256xf32>
    %104 = tpu.matmul %101, %103, %cst_58 {dimension_numbers = #tpu.dot_dimension_numbers<[1], [0], [0], [1], [0, 0, 1, 1], [], []>} : vector<8x16xf32>, vector<16x256xf32>, vector<8x256xf32> -> vector<8x256xf32>
    %105 = arith.addf %98, %104 : vector<8x256xf32>
    %106 = vector.extract_strided_slice %0 {offsets = [0, 14], sizes = [8, 1], strides = [1, 1]} : vector<8x36xf32> to vector<8x1xf32>
    %107 = vector.broadcast %106 : vector<8x1xf32> to vector<8x16xf32>
    %108 = arith.mulf %71, %107 : vector<8x16xf32>
    %c5_59 = arith.constant 5 : index
    %c0_60 = arith.constant 0 : index
    %c0_61 = arith.constant 0 : index
    %109 = vector.load %arg8[%c5_59, %c0_60, %c0_61] : memref<9x16x256xf32, #tpu.memory_space<vmem>>, vector<1x16x256xf32>
    %110 = vector.shape_cast %109 : vector<1x16x256xf32> to vector<16x256xf32>
    %cst_62 = arith.constant dense<0.000000e+00> : vector<8x256xf32>
    %111 = tpu.matmul %108, %110, %cst_62 {dimension_numbers = #tpu.dot_dimension_numbers<[1], [0], [0], [1], [0, 0, 1, 1], [], []>} : vector<8x16xf32>, vector<16x256xf32>, vector<8x256xf32> -> vector<8x256xf32>
    %112 = arith.addf %105, %111 : vector<8x256xf32>
    %113 = vector.extract_strided_slice %0 {offsets = [0, 15], sizes = [8, 1], strides = [1, 1]} : vector<8x36xf32> to vector<8x1xf32>
    %114 = vector.broadcast %113 : vector<8x1xf32> to vector<8x16xf32>
    %115 = arith.mulf %71, %114 : vector<8x16xf32>
    %c6_63 = arith.constant 6 : index
    %c0_64 = arith.constant 0 : index
    %c0_65 = arith.constant 0 : index
    %116 = vector.load %arg8[%c6_63, %c0_64, %c0_65] : memref<9x16x256xf32, #tpu.memory_space<vmem>>, vector<1x16x256xf32>
    %117 = vector.shape_cast %116 : vector<1x16x256xf32> to vector<16x256xf32>
    %cst_66 = arith.constant dense<0.000000e+00> : vector<8x256xf32>
    %118 = tpu.matmul %115, %117, %cst_66 {dimension_numbers = #tpu.dot_dimension_numbers<[1], [0], [0], [1], [0, 0, 1, 1], [], []>} : vector<8x16xf32>, vector<16x256xf32>, vector<8x256xf32> -> vector<8x256xf32>
    %119 = arith.addf %112, %118 : vector<8x256xf32>
    %120 = vector.extract_strided_slice %0 {offsets = [0, 16], sizes = [8, 1], strides = [1, 1]} : vector<8x36xf32> to vector<8x1xf32>
    %121 = vector.broadcast %120 : vector<8x1xf32> to vector<8x16xf32>
    %122 = arith.mulf %71, %121 : vector<8x16xf32>
    %c7_67 = arith.constant 7 : index
    %c0_68 = arith.constant 0 : index
    %c0_69 = arith.constant 0 : index
    %123 = vector.load %arg8[%c7_67, %c0_68, %c0_69] : memref<9x16x256xf32, #tpu.memory_space<vmem>>, vector<1x16x256xf32>
    %124 = vector.shape_cast %123 : vector<1x16x256xf32> to vector<16x256xf32>
    %cst_70 = arith.constant dense<0.000000e+00> : vector<8x256xf32>
    %125 = tpu.matmul %122, %124, %cst_70 {dimension_numbers = #tpu.dot_dimension_numbers<[1], [0], [0], [1], [0, 0, 1, 1], [], []>} : vector<8x16xf32>, vector<16x256xf32>, vector<8x256xf32> -> vector<8x256xf32>
    %126 = arith.addf %119, %125 : vector<8x256xf32>
    %127 = vector.extract_strided_slice %0 {offsets = [0, 17], sizes = [8, 1], strides = [1, 1]} : vector<8x36xf32> to vector<8x1xf32>
    %128 = vector.broadcast %127 : vector<8x1xf32> to vector<8x16xf32>
    %129 = arith.mulf %71, %128 : vector<8x16xf32>
    %c8_71 = arith.constant 8 : index
    %c0_72 = arith.constant 0 : index
    %c0_73 = arith.constant 0 : index
    %130 = vector.load %arg8[%c8_71, %c0_72, %c0_73] : memref<9x16x256xf32, #tpu.memory_space<vmem>>, vector<1x16x256xf32>
    %131 = vector.shape_cast %130 : vector<1x16x256xf32> to vector<16x256xf32>
    %cst_74 = arith.constant dense<0.000000e+00> : vector<8x256xf32>
    %132 = tpu.matmul %129, %131, %cst_74 {dimension_numbers = #tpu.dot_dimension_numbers<[1], [0], [0], [1], [0, 0, 1, 1], [], []>} : vector<8x16xf32>, vector<16x256xf32>, vector<8x256xf32> -> vector<8x256xf32>
    %133 = arith.addf %126, %132 : vector<8x256xf32>
    %134 = arith.truncf %133 : vector<8x256xf32> to vector<8x256xbf16>
    %c1_75 = arith.constant 1 : index
    %c0_76 = arith.constant 0 : index
    %c0_77 = arith.constant 0 : index
    %135 = vector.load %arg11[%c1_75, %c0_76, %c0_77] : memref<4x8x256xbf16, #tpu.memory_space<vmem>>, vector<1x8x256xbf16>
    %136 = vector.shape_cast %135 : vector<1x8x256xbf16> to vector<8x256xbf16>
    %137 = vector.shape_cast %134 : vector<8x256xbf16> to vector<1x8x256xbf16>
    tpu.vector_store %arg11[%c1_75, %c0_76, %c0_77], %137 {strides = array<i32>} : memref<4x8x256xbf16, #tpu.memory_space<vmem>>, vector<1x8x256xbf16>,
    %c0_78 = arith.constant 0 : index
    %c0_79 = arith.constant 0 : index
    %138 = vector.load %arg5[%c0_78, %c0_79] : memref<16x8xf32, #tpu.memory_space<vmem>>, vector<16x8xf32>
    %cst_80 = arith.constant dense<0.000000e+00> : vector<8x8xf32>
    %139 = tpu.matmul %71, %138, %cst_80 {dimension_numbers = #tpu.dot_dimension_numbers<[1], [0], [0], [1], [0, 0, 1, 1], [], []>} : vector<8x16xf32>, vector<16x8xf32>, vector<8x8xf32> -> vector<8x8xf32>
    %140 = vector.extract_strided_slice %0 {offsets = [0, 18], sizes = [8, 1], strides = [1, 1]} : vector<8x36xf32> to vector<8x1xf32>
    %141 = vector.broadcast %140 : vector<8x1xf32> to vector<8x8xf32>
    %142 = arith.mulf %139, %141 : vector<8x8xf32>
    %c0_81 = arith.constant 0 : index
    %c0_82 = arith.constant 0 : index
    %c0_83 = arith.constant 0 : index
    %143 = vector.load %arg9[%c0_81, %c0_82, %c0_83] : memref<9x8x256xf32, #tpu.memory_space<vmem>>, vector<1x8x256xf32>
    %144 = vector.shape_cast %143 : vector<1x8x256xf32> to vector<8x256xf32>
    %cst_84 = arith.constant dense<0.000000e+00> : vector<8x256xf32>
    %145 = tpu.matmul %142, %144, %cst_84 {dimension_numbers = #tpu.dot_dimension_numbers<[1], [0], [0], [1], [0, 0, 1, 1], [], []>} : vector<8x8xf32>, vector<8x256xf32>, vector<8x256xf32> -> vector<8x256xf32>
    %146 = vector.extract_strided_slice %0 {offsets = [0, 19], sizes = [8, 1], strides = [1, 1]} : vector<8x36xf32> to vector<8x1xf32>
    %147 = vector.broadcast %146 : vector<8x1xf32> to vector<8x8xf32>
    %148 = arith.mulf %139, %147 : vector<8x8xf32>
    %c1_85 = arith.constant 1 : index
    %c0_86 = arith.constant 0 : index
    %c0_87 = arith.constant 0 : index
    %149 = vector.load %arg9[%c1_85, %c0_86, %c0_87] : memref<9x8x256xf32, #tpu.memory_space<vmem>>, vector<1x8x256xf32>
    %150 = vector.shape_cast %149 : vector<1x8x256xf32> to vector<8x256xf32>
    %cst_88 = arith.constant dense<0.000000e+00> : vector<8x256xf32>
    %151 = tpu.matmul %148, %150, %cst_88 {dimension_numbers = #tpu.dot_dimension_numbers<[1], [0], [0], [1], [0, 0, 1, 1], [], []>} : vector<8x8xf32>, vector<8x256xf32>, vector<8x256xf32> -> vector<8x256xf32>
    %152 = arith.addf %145, %151 : vector<8x256xf32>
    %153 = vector.extract_strided_slice %0 {offsets = [0, 20], sizes = [8, 1], strides = [1, 1]} : vector<8x36xf32> to vector<8x1xf32>
    %154 = vector.broadcast %153 : vector<8x1xf32> to vector<8x8xf32>
    %155 = arith.mulf %139, %154 : vector<8x8xf32>
    %c2_89 = arith.constant 2 : index
    %c0_90 = arith.constant 0 : index
    %c0_91 = arith.constant 0 : index
    %156 = vector.load %arg9[%c2_89, %c0_90, %c0_91] : memref<9x8x256xf32, #tpu.memory_space<vmem>>, vector<1x8x256xf32>
    %157 = vector.shape_cast %156 : vector<1x8x256xf32> to vector<8x256xf32>
    %cst_92 = arith.constant dense<0.000000e+00> : vector<8x256xf32>
    %158 = tpu.matmul %155, %157, %cst_92 {dimension_numbers = #tpu.dot_dimension_numbers<[1], [0], [0], [1], [0, 0, 1, 1], [], []>} : vector<8x8xf32>, vector<8x256xf32>, vector<8x256xf32> -> vector<8x256xf32>
    %159 = arith.addf %152, %158 : vector<8x256xf32>
    %160 = vector.extract_strided_slice %0 {offsets = [0, 21], sizes = [8, 1], strides = [1, 1]} : vector<8x36xf32> to vector<8x1xf32>
    %161 = vector.broadcast %160 : vector<8x1xf32> to vector<8x8xf32>
    %162 = arith.mulf %139, %161 : vector<8x8xf32>
    %c3_93 = arith.constant 3 : index
    %c0_94 = arith.constant 0 : index
    %c0_95 = arith.constant 0 : index
    %163 = vector.load %arg9[%c3_93, %c0_94, %c0_95] : memref<9x8x256xf32, #tpu.memory_space<vmem>>, vector<1x8x256xf32>
    %164 = vector.shape_cast %163 : vector<1x8x256xf32> to vector<8x256xf32>
    %cst_96 = arith.constant dense<0.000000e+00> : vector<8x256xf32>
    %165 = tpu.matmul %162, %164, %cst_96 {dimension_numbers = #tpu.dot_dimension_numbers<[1], [0], [0], [1], [0, 0, 1, 1], [], []>} : vector<8x8xf32>, vector<8x256xf32>, vector<8x256xf32> -> vector<8x256xf32>
    %166 = arith.addf %159, %165 : vector<8x256xf32>
    %167 = vector.extract_strided_slice %0 {offsets = [0, 22], sizes = [8, 1], strides = [1, 1]} : vector<8x36xf32> to vector<8x1xf32>
    %168 = vector.broadcast %167 : vector<8x1xf32> to vector<8x8xf32>
    %169 = arith.mulf %139, %168 : vector<8x8xf32>
    %c4_97 = arith.constant 4 : index
    %c0_98 = arith.constant 0 : index
    %c0_99 = arith.constant 0 : index
    %170 = vector.load %arg9[%c4_97, %c0_98, %c0_99] : memref<9x8x256xf32, #tpu.memory_space<vmem>>, vector<1x8x256xf32>
    %171 = vector.shape_cast %170 : vector<1x8x256xf32> to vector<8x256xf32>
    %cst_100 = arith.constant dense<0.000000e+00> : vector<8x256xf32>
    %172 = tpu.matmul %169, %171, %cst_100 {dimension_numbers = #tpu.dot_dimension_numbers<[1], [0], [0], [1], [0, 0, 1, 1], [], []>} : vector<8x8xf32>, vector<8x256xf32>, vector<8x256xf32> -> vector<8x256xf32>
    %173 = arith.addf %166, %172 : vector<8x256xf32>
    %174 = vector.extract_strided_slice %0 {offsets = [0, 23], sizes = [8, 1], strides = [1, 1]} : vector<8x36xf32> to vector<8x1xf32>
    %175 = vector.broadcast %174 : vector<8x1xf32> to vector<8x8xf32>
    %176 = arith.mulf %139, %175 : vector<8x8xf32>
    %c5_101 = arith.constant 5 : index
    %c0_102 = arith.constant 0 : index
    %c0_103 = arith.constant 0 : index
    %177 = vector.load %arg9[%c5_101, %c0_102, %c0_103] : memref<9x8x256xf32, #tpu.memory_space<vmem>>, vector<1x8x256xf32>
    %178 = vector.shape_cast %177 : vector<1x8x256xf32> to vector<8x256xf32>
    %cst_104 = arith.constant dense<0.000000e+00> : vector<8x256xf32>
    %179 = tpu.matmul %176, %178, %cst_104 {dimension_numbers = #tpu.dot_dimension_numbers<[1], [0], [0], [1], [0, 0, 1, 1], [], []>} : vector<8x8xf32>, vector<8x256xf32>, vector<8x256xf32> -> vector<8x256xf32>
    %180 = arith.addf %173, %179 : vector<8x256xf32>
    %181 = vector.extract_strided_slice %0 {offsets = [0, 24], sizes = [8, 1], strides = [1, 1]} : vector<8x36xf32> to vector<8x1xf32>
    %182 = vector.broadcast %181 : vector<8x1xf32> to vector<8x8xf32>
    %183 = arith.mulf %139, %182 : vector<8x8xf32>
    %c6_105 = arith.constant 6 : index
    %c0_106 = arith.constant 0 : index
    %c0_107 = arith.constant 0 : index
    %184 = vector.load %arg9[%c6_105, %c0_106, %c0_107] : memref<9x8x256xf32, #tpu.memory_space<vmem>>, vector<1x8x256xf32>
    %185 = vector.shape_cast %184 : vector<1x8x256xf32> to vector<8x256xf32>
    %cst_108 = arith.constant dense<0.000000e+00> : vector<8x256xf32>
    %186 = tpu.matmul %183, %185, %cst_108 {dimension_numbers = #tpu.dot_dimension_numbers<[1], [0], [0], [1], [0, 0, 1, 1], [], []>} : vector<8x8xf32>, vector<8x256xf32>, vector<8x256xf32> -> vector<8x256xf32>
    %187 = arith.addf %180, %186 : vector<8x256xf32>
    %188 = vector.extract_strided_slice %0 {offsets = [0, 25], sizes = [8, 1], strides = [1, 1]} : vector<8x36xf32> to vector<8x1xf32>
    %189 = vector.broadcast %188 : vector<8x1xf32> to vector<8x8xf32>
    %190 = arith.mulf %139, %189 : vector<8x8xf32>
    %c7_109 = arith.constant 7 : index
    %c0_110 = arith.constant 0 : index
    %c0_111 = arith.constant 0 : index
    %191 = vector.load %arg9[%c7_109, %c0_110, %c0_111] : memref<9x8x256xf32, #tpu.memory_space<vmem>>, vector<1x8x256xf32>
    %192 = vector.shape_cast %191 : vector<1x8x256xf32> to vector<8x256xf32>
    %cst_112 = arith.constant dense<0.000000e+00> : vector<8x256xf32>
    %193 = tpu.matmul %190, %192, %cst_112 {dimension_numbers = #tpu.dot_dimension_numbers<[1], [0], [0], [1], [0, 0, 1, 1], [], []>} : vector<8x8xf32>, vector<8x256xf32>, vector<8x256xf32> -> vector<8x256xf32>
    %194 = arith.addf %187, %193 : vector<8x256xf32>
    %195 = vector.extract_strided_slice %0 {offsets = [0, 26], sizes = [8, 1], strides = [1, 1]} : vector<8x36xf32> to vector<8x1xf32>
    %196 = vector.broadcast %195 : vector<8x1xf32> to vector<8x8xf32>
    %197 = arith.mulf %139, %196 : vector<8x8xf32>
    %c8_113 = arith.constant 8 : index
    %c0_114 = arith.constant 0 : index
    %c0_115 = arith.constant 0 : index
    %198 = vector.load %arg9[%c8_113, %c0_114, %c0_115] : memref<9x8x256xf32, #tpu.memory_space<vmem>>, vector<1x8x256xf32>
    %199 = vector.shape_cast %198 : vector<1x8x256xf32> to vector<8x256xf32>
    %cst_116 = arith.constant dense<0.000000e+00> : vector<8x256xf32>
    %200 = tpu.matmul %197, %199, %cst_116 {dimension_numbers = #tpu.dot_dimension_numbers<[1], [0], [0], [1], [0, 0, 1, 1], [], []>} : vector<8x8xf32>, vector<8x256xf32>, vector<8x256xf32> -> vector<8x256xf32>
    %201 = arith.addf %194, %200 : vector<8x256xf32>
    %202 = arith.truncf %201 : vector<8x256xf32> to vector<8x256xbf16>
    %c2_117 = arith.constant 2 : index
    %c0_118 = arith.constant 0 : index
    %c0_119 = arith.constant 0 : index
    %203 = vector.load %arg11[%c2_117, %c0_118, %c0_119] : memref<4x8x256xbf16, #tpu.memory_space<vmem>>, vector<1x8x256xbf16>
    %204 = vector.shape_cast %203 : vector<1x8x256xbf16> to vector<8x256xbf16>
    %205 = vector.shape_cast %202 : vector<8x256xbf16> to vector<1x8x256xbf16>
    tpu.vector_store %arg11[%c2_117, %c0_118, %c0_119], %205 {strides = array<i32>} : memref<4x8x256xbf16, #tpu.memory_space<vmem>>, vector<1x8x256xbf16>,
    %c0_120 = arith.constant 0 : index
    %c0_121 = arith.constant 0 : index
    %206 = vector.load %arg6[%c0_120, %c0_121] : memref<8x8xf32, #tpu.memory_space<vmem>>, vector<8x8xf32>
    %cst_122 = arith.constant dense<0.000000e+00> : vector<8x8xf32>
    %207 = tpu.matmul %139, %206, %cst_122 {dimension_numbers = #tpu.dot_dimension_numbers<[1], [0], [0], [1], [0, 0, 1, 1], [], []>} : vector<8x8xf32>, vector<8x8xf32>, vector<8x8xf32> -> vector<8x8xf32>
    %208 = vector.extract_strided_slice %0 {offsets = [0, 27], sizes = [8, 1], strides = [1, 1]} : vector<8x36xf32> to vector<8x1xf32>
    %209 = vector.broadcast %208 : vector<8x1xf32> to vector<8x8xf32>
    %210 = arith.mulf %207, %209 : vector<8x8xf32>
    %c0_123 = arith.constant 0 : index
    %c0_124 = arith.constant 0 : index
    %c0_125 = arith.constant 0 : index
    %211 = vector.load %arg10[%c0_123, %c0_124, %c0_125] : memref<9x8x256xf32, #tpu.memory_space<vmem>>, vector<1x8x256xf32>
    %212 = vector.shape_cast %211 : vector<1x8x256xf32> to vector<8x256xf32>
    %cst_126 = arith.constant dense<0.000000e+00> : vector<8x256xf32>
    %213 = tpu.matmul %210, %212, %cst_126 {dimension_numbers = #tpu.dot_dimension_numbers<[1], [0], [0], [1], [0, 0, 1, 1], [], []>} : vector<8x8xf32>, vector<8x256xf32>, vector<8x256xf32> -> vector<8x256xf32>
    %214 = vector.extract_strided_slice %0 {offsets = [0, 28], sizes = [8, 1], strides = [1, 1]} : vector<8x36xf32> to vector<8x1xf32>
    %215 = vector.broadcast %214 : vector<8x1xf32> to vector<8x8xf32>
    %216 = arith.mulf %207, %215 : vector<8x8xf32>
    %c1_127 = arith.constant 1 : index
    %c0_128 = arith.constant 0 : index
    %c0_129 = arith.constant 0 : index
    %217 = vector.load %arg10[%c1_127, %c0_128, %c0_129] : memref<9x8x256xf32, #tpu.memory_space<vmem>>, vector<1x8x256xf32>
    %218 = vector.shape_cast %217 : vector<1x8x256xf32> to vector<8x256xf32>
    %cst_130 = arith.constant dense<0.000000e+00> : vector<8x256xf32>
    %219 = tpu.matmul %216, %218, %cst_130 {dimension_numbers = #tpu.dot_dimension_numbers<[1], [0], [0], [1], [0, 0, 1, 1], [], []>} : vector<8x8xf32>, vector<8x256xf32>, vector<8x256xf32> -> vector<8x256xf32>
    %220 = arith.addf %213, %219 : vector<8x256xf32>
    %221 = vector.extract_strided_slice %0 {offsets = [0, 29], sizes = [8, 1], strides = [1, 1]} : vector<8x36xf32> to vector<8x1xf32>
    %222 = vector.broadcast %221 : vector<8x1xf32> to vector<8x8xf32>
    %223 = arith.mulf %207, %222 : vector<8x8xf32>
    %c2_131 = arith.constant 2 : index
    %c0_132 = arith.constant 0 : index
    %c0_133 = arith.constant 0 : index
    %224 = vector.load %arg10[%c2_131, %c0_132, %c0_133] : memref<9x8x256xf32, #tpu.memory_space<vmem>>, vector<1x8x256xf32>
    %225 = vector.shape_cast %224 : vector<1x8x256xf32> to vector<8x256xf32>
    %cst_134 = arith.constant dense<0.000000e+00> : vector<8x256xf32>
    %226 = tpu.matmul %223, %225, %cst_134 {dimension_numbers = #tpu.dot_dimension_numbers<[1], [0], [0], [1], [0, 0, 1, 1], [], []>} : vector<8x8xf32>, vector<8x256xf32>, vector<8x256xf32> -> vector<8x256xf32>
    %227 = arith.addf %220, %226 : vector<8x256xf32>
    %228 = vector.extract_strided_slice %0 {offsets = [0, 30], sizes = [8, 1], strides = [1, 1]} : vector<8x36xf32> to vector<8x1xf32>
    %229 = vector.broadcast %228 : vector<8x1xf32> to vector<8x8xf32>
    %230 = arith.mulf %207, %229 : vector<8x8xf32>
    %c3_135 = arith.constant 3 : index
    %c0_136 = arith.constant 0 : index
    %c0_137 = arith.constant 0 : index
    %231 = vector.load %arg10[%c3_135, %c0_136, %c0_137] : memref<9x8x256xf32, #tpu.memory_space<vmem>>, vector<1x8x256xf32>
    %232 = vector.shape_cast %231 : vector<1x8x256xf32> to vector<8x256xf32>
    %cst_138 = arith.constant dense<0.000000e+00> : vector<8x256xf32>
    %233 = tpu.matmul %230, %232, %cst_138 {dimension_numbers = #tpu.dot_dimension_numbers<[1], [0], [0], [1], [0, 0, 1, 1], [], []>} : vector<8x8xf32>, vector<8x256xf32>, vector<8x256xf32> -> vector<8x256xf32>
    %234 = arith.addf %227, %233 : vector<8x256xf32>
    %235 = vector.extract_strided_slice %0 {offsets = [0, 31], sizes = [8, 1], strides = [1, 1]} : vector<8x36xf32> to vector<8x1xf32>
    %236 = vector.broadcast %235 : vector<8x1xf32> to vector<8x8xf32>
    %237 = arith.mulf %207, %236 : vector<8x8xf32>
    %c4_139 = arith.constant 4 : index
    %c0_140 = arith.constant 0 : index
    %c0_141 = arith.constant 0 : index
    %238 = vector.load %arg10[%c4_139, %c0_140, %c0_141] : memref<9x8x256xf32, #tpu.memory_space<vmem>>, vector<1x8x256xf32>
    %239 = vector.shape_cast %238 : vector<1x8x256xf32> to vector<8x256xf32>
    %cst_142 = arith.constant dense<0.000000e+00> : vector<8x256xf32>
    %240 = tpu.matmul %237, %239, %cst_142 {dimension_numbers = #tpu.dot_dimension_numbers<[1], [0], [0], [1], [0, 0, 1, 1], [], []>} : vector<8x8xf32>, vector<8x256xf32>, vector<8x256xf32> -> vector<8x256xf32>
    %241 = arith.addf %234, %240 : vector<8x256xf32>
    %242 = vector.extract_strided_slice %0 {offsets = [0, 32], sizes = [8, 1], strides = [1, 1]} : vector<8x36xf32> to vector<8x1xf32>
    %243 = vector.broadcast %242 : vector<8x1xf32> to vector<8x8xf32>
    %244 = arith.mulf %207, %243 : vector<8x8xf32>
    %c5_143 = arith.constant 5 : index
    %c0_144 = arith.constant 0 : index
    %c0_145 = arith.constant 0 : index
    %245 = vector.load %arg10[%c5_143, %c0_144, %c0_145] : memref<9x8x256xf32, #tpu.memory_space<vmem>>, vector<1x8x256xf32>
    %246 = vector.shape_cast %245 : vector<1x8x256xf32> to vector<8x256xf32>
    %cst_146 = arith.constant dense<0.000000e+00> : vector<8x256xf32>
    %247 = tpu.matmul %244, %246, %cst_146 {dimension_numbers = #tpu.dot_dimension_numbers<[1], [0], [0], [1], [0, 0, 1, 1], [], []>} : vector<8x8xf32>, vector<8x256xf32>, vector<8x256xf32> -> vector<8x256xf32>
    %248 = arith.addf %241, %247 : vector<8x256xf32>
    %249 = vector.extract_strided_slice %0 {offsets = [0, 33], sizes = [8, 1], strides = [1, 1]} : vector<8x36xf32> to vector<8x1xf32>
    %250 = vector.broadcast %249 : vector<8x1xf32> to vector<8x8xf32>
    %251 = arith.mulf %207, %250 : vector<8x8xf32>
    %c6_147 = arith.constant 6 : index
    %c0_148 = arith.constant 0 : index
    %c0_149 = arith.constant 0 : index
    %252 = vector.load %arg10[%c6_147, %c0_148, %c0_149] : memref<9x8x256xf32, #tpu.memory_space<vmem>>, vector<1x8x256xf32>
    %253 = vector.shape_cast %252 : vector<1x8x256xf32> to vector<8x256xf32>
    %cst_150 = arith.constant dense<0.000000e+00> : vector<8x256xf32>
    %254 = tpu.matmul %251, %253, %cst_150 {dimension_numbers = #tpu.dot_dimension_numbers<[1], [0], [0], [1], [0, 0, 1, 1], [], []>} : vector<8x8xf32>, vector<8x256xf32>, vector<8x256xf32> -> vector<8x256xf32>
    %255 = arith.addf %248, %254 : vector<8x256xf32>
    %256 = vector.extract_strided_slice %0 {offsets = [0, 34], sizes = [8, 1], strides = [1, 1]} : vector<8x36xf32> to vector<8x1xf32>
    %257 = vector.broadcast %256 : vector<8x1xf32> to vector<8x8xf32>
    %258 = arith.mulf %207, %257 : vector<8x8xf32>
    %c7_151 = arith.constant 7 : index
    %c0_152 = arith.constant 0 : index
    %c0_153 = arith.constant 0 : index
    %259 = vector.load %arg10[%c7_151, %c0_152, %c0_153] : memref<9x8x256xf32, #tpu.memory_space<vmem>>, vector<1x8x256xf32>
    %260 = vector.shape_cast %259 : vector<1x8x256xf32> to vector<8x256xf32>
    %cst_154 = arith.constant dense<0.000000e+00> : vector<8x256xf32>
    %261 = tpu.matmul %258, %260, %cst_154 {dimension_numbers = #tpu.dot_dimension_numbers<[1], [0], [0], [1], [0, 0, 1, 1], [], []>} : vector<8x8xf32>, vector<8x256xf32>, vector<8x256xf32> -> vector<8x256xf32>
    %262 = arith.addf %255, %261 : vector<8x256xf32>
    %263 = vector.extract_strided_slice %0 {offsets = [0, 35], sizes = [8, 1], strides = [1, 1]} : vector<8x36xf32> to vector<8x1xf32>
    %264 = vector.broadcast %263 : vector<8x1xf32> to vector<8x8xf32>
    %265 = arith.mulf %207, %264 : vector<8x8xf32>
    %c8_155 = arith.constant 8 : index
    %c0_156 = arith.constant 0 : index
    %c0_157 = arith.constant 0 : index
    %266 = vector.load %arg10[%c8_155, %c0_156, %c0_157] : memref<9x8x256xf32, #tpu.memory_space<vmem>>, vector<1x8x256xf32>
    %267 = vector.shape_cast %266 : vector<1x8x256xf32> to vector<8x256xf32>
    %cst_158 = arith.constant dense<0.000000e+00> : vector<8x256xf32>
    %268 = tpu.matmul %265, %267, %cst_158 {dimension_numbers = #tpu.dot_dimension_numbers<[1], [0], [0], [1], [0, 0, 1, 1], [], []>} : vector<8x8xf32>, vector<8x256xf32>, vector<8x256xf32> -> vector<8x256xf32>
    %269 = arith.addf %262, %268 : vector<8x256xf32>
    %270 = arith.truncf %269 : vector<8x256xf32> to vector<8x256xbf16>
    %c3_159 = arith.constant 3 : index
    %c0_160 = arith.constant 0 : index
    %c0_161 = arith.constant 0 : index
    %271 = vector.load %arg11[%c3_159, %c0_160, %c0_161] : memref<4x8x256xbf16, #tpu.memory_space<vmem>>, vector<1x8x256xbf16>
    %272 = vector.shape_cast %271 : vector<1x8x256xbf16> to vector<8x256xbf16>
    %273 = vector.shape_cast %270 : vector<8x256xbf16> to vector<1x8x256xbf16>
    tpu.vector_store %arg11[%c3_159, %c0_160, %c0_161], %273 {strides = array<i32>} : memref<4x8x256xbf16, #tpu.memory_space<vmem>>, vector<1x8x256xbf16>,
    return
  }
  func.func @transform_0(%arg0: i32) -> (i32, i32) {
    %c0_i32 = arith.constant 0 : i32
    %c0_i32_0 = arith.constant 0 : i32
    return %arg0, %c0_i32 : i32, i32
  }
  func.func @transform_1(%arg0: i32) -> (i32, i32) {
    %c0_i32 = arith.constant 0 : i32
    %c0_i32_0 = arith.constant 0 : i32
    return %arg0, %c0_i32 : i32, i32
  }
  func.func @transform_2(%arg0: i32) -> (i32, i32) {
    %c0_i32 = arith.constant 0 : i32
    %c0_i32_0 = arith.constant 0 : i32
    %c0_i32_1 = arith.constant 0 : i32
    return %c0_i32, %c0_i32_0 : i32, i32
  }
  func.func @transform_3(%arg0: i32) -> (i32, i32) {
    %c0_i32 = arith.constant 0 : i32
    %c0_i32_0 = arith.constant 0 : i32
    %c0_i32_1 = arith.constant 0 : i32
    return %c0_i32, %c0_i32_0 : i32, i32
  }
  func.func @transform_4(%arg0: i32) -> (i32, i32) {
    %c0_i32 = arith.constant 0 : i32
    %c0_i32_0 = arith.constant 0 : i32
    %c0_i32_1 = arith.constant 0 : i32
    return %c0_i32, %c0_i32_0 : i32, i32
  }
  func.func @transform_5(%arg0: i32) -> (i32, i32) {
    %c0_i32 = arith.constant 0 : i32
    %c0_i32_0 = arith.constant 0 : i32
    %c0_i32_1 = arith.constant 0 : i32
    return %c0_i32, %c0_i32_0 : i32, i32
  }
  func.func @transform_6(%arg0: i32) -> (i32, i32, i32) {
    %c0_i32 = arith.constant 0 : i32
    %c0_i32_0 = arith.constant 0 : i32
    %c0_i32_1 = arith.constant 0 : i32
    %c0_i32_2 = arith.constant 0 : i32
    return %c0_i32, %c0_i32_0, %c0_i32_1 : i32, i32, i32
  }
  func.func @transform_7(%arg0: i32) -> (i32, i32, i32) {
    %c0_i32 = arith.constant 0 : i32
    %c0_i32_0 = arith.constant 0 : i32
    %c0_i32_1 = arith.constant 0 : i32
    %c0_i32_2 = arith.constant 0 : i32
    return %c0_i32, %c0_i32_0, %c0_i32_1 : i32, i32, i32
  }
  func.func @transform_8(%arg0: i32) -> (i32, i32, i32) {
    %c0_i32 = arith.constant 0 : i32
    %c0_i32_0 = arith.constant 0 : i32
    %c0_i32_1 = arith.constant 0 : i32
    %c0_i32_2 = arith.constant 0 : i32
    return %c0_i32, %c0_i32_0, %c0_i32_1 : i32, i32, i32
  }
  func.func @transform_9(%arg0: i32) -> (i32, i32, i32) {
    %c0_i32 = arith.constant 0 : i32
    %c0_i32_0 = arith.constant 0 : i32
    %c0_i32_1 = arith.constant 0 : i32
    %c0_i32_2 = arith.constant 0 : i32
    return %c0_i32, %c0_i32_0, %c0_i32_1 : i32, i32, i32
  }
  func.func @transform_10(%arg0: i32) -> (i32, i32, i32) {
    %c0_i32 = arith.constant 0 : i32
    %c0_i32_0 = arith.constant 0 : i32
    %c0_i32_1 = arith.constant 0 : i32
    return %c0_i32, %arg0, %c0_i32_0 : i32, i32, i32
  }
}

module attributes {stable_mosaic.version = 11 : i64} {
  func.func @_project_kernel(%arg0: i32, %arg1: memref<16x8xbf16, #tpu.memory_space<vmem>>, %arg2: memref<16x32xbf16, #tpu.memory_space<vmem>>, %arg3: memref<8x512xbf16, #tpu.memory_space<vmem>>, %arg4: memref<32x512xbf16, #tpu.memory_space<vmem>>, %arg5: memref<16x1xf32, #tpu.memory_space<vmem>>, %arg6: memref<16x1xf32, #tpu.memory_space<vmem>>, %arg7: memref<16x1xf32, #tpu.memory_space<vmem>>, %arg8: memref<16x512xf32, #tpu.memory_space<vmem>>) attributes {dimension_semantics = [#tpu.dimension_semantics<parallel>], iteration_bounds = array<i64: 2>, scalar_prefetch = 0 : i64, scratch_operands = 0 : i64, tpu.core_type = #tpu.core_type<tc>, window_params = [{transform_indices = @transform_0, window_bounds = array<i64: 16, 8>}, {transform_indices = @transform_1, window_bounds = array<i64: 16, 32>}, {pipeline_mode = #tpu.pipeline_mode<synchronous>, transform_indices = @transform_2, window_bounds = array<i64: 8, 512>}, {pipeline_mode = #tpu.pipeline_mode<synchronous>, transform_indices = @transform_3, window_bounds = array<i64: 32, 512>}, {transform_indices = @transform_4, window_bounds = array<i64: 16, 1>}, {transform_indices = @transform_5, window_bounds = array<i64: 16, 1>}, {transform_indices = @transform_6, window_bounds = array<i64: 16, 1>}, {transform_indices = @transform_7, window_bounds = array<i64: 16, 512>}]} {
    %c0 = arith.constant 0 : index
    %c0_0 = arith.constant 0 : index
    %0 = vector.load %arg1[%c0, %c0_0] : memref<16x8xbf16, #tpu.memory_space<vmem>>, vector<16x8xbf16>
    %c0_1 = arith.constant 0 : index
    %c0_2 = arith.constant 0 : index
    %1 = vector.load %arg3[%c0_1, %c0_2] : memref<8x512xbf16, #tpu.memory_space<vmem>>, vector<8x512xbf16>
    %cst = arith.constant dense<0.000000e+00> : vector<16x512xf32>
    %2 = tpu.matmul %0, %1, %cst {dimension_numbers = #tpu.dot_dimension_numbers<[1], [0], [0], [1], [0, 0, 1, 1], [], []>} : vector<16x8xbf16>, vector<8x512xbf16>, vector<16x512xf32> -> vector<16x512xf32>
    %c0_3 = arith.constant 0 : index
    %c0_4 = arith.constant 0 : index
    %3 = vector.load %arg2[%c0_3, %c0_4] : memref<16x32xbf16, #tpu.memory_space<vmem>>, vector<16x32xbf16>
    %c0_5 = arith.constant 0 : index
    %c0_6 = arith.constant 0 : index
    %4 = vector.load %arg4[%c0_5, %c0_6] : memref<32x512xbf16, #tpu.memory_space<vmem>>, vector<32x512xbf16>
    %cst_7 = arith.constant dense<0.000000e+00> : vector<16x512xf32>
    %5 = tpu.matmul %3, %4, %cst_7 {dimension_numbers = #tpu.dot_dimension_numbers<[1], [0], [0], [1], [0, 0, 1, 1], [], []>} : vector<16x32xbf16>, vector<32x512xbf16>, vector<16x512xf32> -> vector<16x512xf32>
    %6 = arith.addf %2, %5 : vector<16x512xf32>
    %cst_8 = arith.constant dense<0.000000e+00> : vector<16xf32>
    %7 = vector.multi_reduction <add>, %6, %cst_8 [1] : vector<16x512xf32> to vector<16xf32>
    %8 = vector.shape_cast %7 : vector<16xf32> to vector<16x1xf32>
    %cst_9 = arith.constant 5.120000e+02 : f32
    %9 = vector.broadcast %cst_9 : f32 to vector<16x1xf32>
    %10 = arith.divf %8, %9 : vector<16x1xf32>
    %11 = arith.mulf %6, %6 : vector<16x512xf32>
    %cst_10 = arith.constant dense<0.000000e+00> : vector<16xf32>
    %12 = vector.multi_reduction <add>, %11, %cst_10 [1] : vector<16x512xf32> to vector<16xf32>
    %13 = vector.shape_cast %12 : vector<16xf32> to vector<16x1xf32>
    %cst_11 = arith.constant 5.120000e+02 : f32
    %14 = vector.broadcast %cst_11 : f32 to vector<16x1xf32>
    %15 = arith.divf %13, %14 : vector<16x1xf32>
    %16 = arith.mulf %10, %10 : vector<16x1xf32>
    %17 = arith.subf %15, %16 : vector<16x1xf32>
    %cst_12 = arith.constant 0.000000e+00 : f32
    %18 = vector.broadcast %cst_12 : f32 to vector<16x1xf32>
    %19 = arith.maximumf %17, %18 : vector<16x1xf32>
    %20 = vector.broadcast %10 : vector<16x1xf32> to vector<16x512xf32>
    %21 = arith.subf %6, %20 : vector<16x512xf32>
    %cst_13 = arith.constant 9.99999974E-6 : f32
    %22 = vector.broadcast %cst_13 : f32 to vector<16x1xf32>
    %23 = arith.addf %19, %22 : vector<16x1xf32>
    %24 = math.rsqrt %23 : vector<16x1xf32>
    %25 = vector.broadcast %24 : vector<16x1xf32> to vector<16x512xf32>
    %26 = arith.mulf %21, %25 : vector<16x512xf32>
    %c0_14 = arith.constant 0 : index
    %c0_15 = arith.constant 0 : index
    %27 = vector.load %arg5[%c0_14, %c0_15] : memref<16x1xf32, #tpu.memory_space<vmem>>, vector<16x1xf32>
    %28 = vector.broadcast %27 : vector<16x1xf32> to vector<16x512xf32>
    %29 = arith.mulf %26, %28 : vector<16x512xf32>
    %c0_16 = arith.constant 0 : index
    %c0_17 = arith.constant 0 : index
    %30 = vector.load %arg6[%c0_16, %c0_17] : memref<16x1xf32, #tpu.memory_space<vmem>>, vector<16x1xf32>
    %31 = vector.broadcast %30 : vector<16x1xf32> to vector<16x512xf32>
    %32 = arith.addf %29, %31 : vector<16x512xf32>
    %cst_18 = arith.constant 0.000000e+00 : f32
    %33 = vector.broadcast %cst_18 : f32 to vector<16x512xf32>
    %34 = arith.cmpf oge, %32, %33 : vector<16x512xf32>
    %c0_19 = arith.constant 0 : index
    %c0_20 = arith.constant 0 : index
    %35 = vector.load %arg7[%c0_19, %c0_20] : memref<16x1xf32, #tpu.memory_space<vmem>>, vector<16x1xf32>
    %36 = vector.broadcast %35 : vector<16x1xf32> to vector<16x512xf32>
    %37 = arith.mulf %36, %32 : vector<16x512xf32>
    %38 = arith.select %34, %32, %37 : vector<16x512xi1>, vector<16x512xf32>
    %c0_21 = arith.constant 0 : index
    %c0_22 = arith.constant 0 : index
    %39 = vector.load %arg8[%c0_21, %c0_22] : memref<16x512xf32, #tpu.memory_space<vmem>>, vector<16x512xf32>
    tpu.vector_store %arg8[%c0_21, %c0_22], %38 {strides = array<i32>} : memref<16x512xf32, #tpu.memory_space<vmem>>, vector<16x512xf32>,
    return
  }
  func.func @transform_0(%arg0: i32) -> (i32, i32) {
    %c0_i32 = arith.constant 0 : i32
    %c0_i32_0 = arith.constant 0 : i32
    return %arg0, %c0_i32 : i32, i32
  }
  func.func @transform_1(%arg0: i32) -> (i32, i32) {
    %c0_i32 = arith.constant 0 : i32
    %c0_i32_0 = arith.constant 0 : i32
    return %arg0, %c0_i32 : i32, i32
  }
  func.func @transform_2(%arg0: i32) -> (i32, i32) {
    %c0_i32 = arith.constant 0 : i32
    %c0_i32_0 = arith.constant 0 : i32
    %c0_i32_1 = arith.constant 0 : i32
    return %c0_i32, %c0_i32_0 : i32, i32
  }
  func.func @transform_3(%arg0: i32) -> (i32, i32) {
    %c0_i32 = arith.constant 0 : i32
    %c0_i32_0 = arith.constant 0 : i32
    %c0_i32_1 = arith.constant 0 : i32
    return %c0_i32, %c0_i32_0 : i32, i32
  }
  func.func @transform_4(%arg0: i32) -> (i32, i32) {
    %c0_i32 = arith.constant 0 : i32
    %c0_i32_0 = arith.constant 0 : i32
    return %arg0, %c0_i32 : i32, i32
  }
  func.func @transform_5(%arg0: i32) -> (i32, i32) {
    %c0_i32 = arith.constant 0 : i32
    %c0_i32_0 = arith.constant 0 : i32
    return %arg0, %c0_i32 : i32, i32
  }
  func.func @transform_6(%arg0: i32) -> (i32, i32) {
    %c0_i32 = arith.constant 0 : i32
    %c0_i32_0 = arith.constant 0 : i32
    return %arg0, %c0_i32 : i32, i32
  }
  func.func @transform_7(%arg0: i32) -> (i32, i32) {
    %c0_i32 = arith.constant 0 : i32
    %c0_i32_0 = arith.constant 0 : i32
    return %arg0, %c0_i32 : i32, i32
  }
}

</mosaic_0001>

<bundles_post_ra>
// kernel: psp_forward.3
= control target key start
LH: loop header
LB: loop body
LE: loop exit
PB: predicated region body
PF: predicated region fallthrough
CT: control target
= control target key end

     0   :  { %s1020_s24 = smov 0   ;;  %s1148_s0 = inlined_call_operand.vmem [shape: bf16[32,8], index: 0, kind: input, shape index: {}]   ;;  %s1149_s1 = inlined_call_operand.vmem [shape: bf16[32,32], index: 1, kind: input, shape index: {}]   ;;  %s1150_s2 = inlined_call_operand.vmem [shape: bf16[8,512], index: 2, kind: input, shape index: {}]   ;;  %s1151_s3 = inlined_call_operand.vmem [shape: bf16[32,512], index: 3, kind: input, shape index: {}]   ;;  %s1152_s4 = inlined_call_operand.vmem [shape: f32[32,1], index: 4, kind: input, shape index: {}]   ;;  %s1153_s5 = inlined_call_operand.vmem [shape: f32[32,1], index: 5, kind: input, shape index: {}]   ;;  %s1154_s6 = inlined_call_operand.vmem [shape: f32[32,1], index: 6, kind: input, shape index: {}]   ;;  %s1155_s7 = inlined_call_operand.vmem [shape: f32[32,512], index: 7, kind: output, shape index: {}]  }
   0x1 LB: > { %s889_s25 = sadd.s32 4294967295, %s977_s24   ;;  %p893_p0 = scmp.ge.s32.totalorder %s977_s24, 1  ;;  %s977_s24 = sphi %s1020_s24, %s17_s24  }
   0x2   : > { %p282_p1 = scmp.lt.s32.totalorder %s977_s24, 3 }
   0x4   : > { %p283_p2 = pnand %p893_p0, %p282_p1 }
   0x5   : > { %v949_v0 = vld [vmem:[%s1151_s3 + $0x4] ss:$16 sps:$4 sm:$0xff] (!%p283_p2)   ;;  %s894_s28 = sshll.u32 (!%p283_p2), %s889_s25, 1  ;;  %v951_v1 = vld [vmem:[%s1151_s3 + $0xc] ss:$16 sps:$4 sm:$0xff] (!%p283_p2)   ;;  %v979_v2 = vmov (!%p283_p2), 0  }
   0x6   : > { %286 = sbr.rel (%p283_p2) target bundleno = 429 (0x1ad), region = 48  ;;  %468 = vmatprep.mubr.bf16.mxu0 (!%p283_p2), %v979_v2  ;;  %511 = vmatprep.mubr.bf16.mxu1 (!%p283_p2), %v979_v2  ;;  %p336_p3 = scmp.lt.s32.totalorder (!%p283_p2), %s894_s28, 3  ;;  %v953_v3 = vld [vmem:[%s1151_s3] ss:$16 sps:$4 sm:$0xff] (!%p283_p2)   ;;  %v954_v4 = vld [vmem:[%s1151_s3 + $0x8] ss:$16 sps:$4 sm:$0xff] (!%p283_p2)  }
   0x7   : > { %436 = vmatprep.subr.bf16.mxu0 (!%p283_p2), %v949_v0  ;;  %948 = vset.pattern.permute.xlu1 (!%p283_p2), %v979_v2  ;;  %v955_v5 = vld [vmem:[%s1151_s3 + $0x24] ss:$16 sps:$4 sm:$0xff] (!%p283_p2)   ;;  %v957_v6 = vld [vmem:[%s1151_s3 + $0x2c] ss:$16 sps:$4 sm:$0xff] (!%p283_p2)   ;;  %v959_v7 = vld [vmem:[%s1151_s3 + $0x20] ss:$16 sps:$4 sm:$0xff] (!%p283_p2)  }
   0x8   : > { %479 = vmatprep.subr.bf16.mxu1 (!%p283_p2), %v951_v1  ;;  %947 = vset.pattern.permute.xlu0 (!%p283_p2), %v979_v2  ;;  %v960_v8 = vld [vmem:[%s1151_s3 + $0x28] ss:$16 sps:$4 sm:$0xff] (!%p283_p2)   ;;  %v375_v9 = vld [vmem:[%s1150_s2] sm:$0xff] (!%p283_p2)  ;;  %vm541_vm0 = vcmask (!%p283_p2), 1043456   ;;  %vm432_vm1 = vcmask (!%p283_p2), 261120   ;;  %vm537_vm2 = vcmask (!%p283_p2), 64512  }
   0x9   : > { %437 = vmatpush1.bf16.msra.mxu0 (!%p283_p2), %v953_v3  ;;  %480 = vmatpush1.bf16.msra.mxu1 (!%p283_p2), %v954_v4  ;;  %v376_v10 = vld [vmem:[%s1150_s2 + $0x8] sm:$0xff] (!%p283_p2)  ;;  %v920_v11 = vcombine.high (!%p283_p2), %v375_v9, %v375_v9  ;;  %v919_v12 = vcombine.low (!%p283_p2), %v375_v9, %v375_v9 }
   0xa   : > { %438 = vmatprep.subr.bf16.mxu0 (!%p283_p2), %v955_v5  ;;  %481 = vmatprep.subr.bf16.mxu1 (!%p283_p2), %v957_v6  ;;  %v922_v13 = vcombine.high (!%p283_p2), %v376_v10, %v376_v10  ;;  %v921_v14 = vcombine.low (!%p283_p2), %v376_v10, %v376_v10 }
   0xb   : > { %v543_v16 = vsel (!%p283_p2), %vm541_vm0, %v919_v12, 0 }
   0xc   : > { %v549_v17 = vsel (!%p283_p2), %vm541_vm0, %v921_v14, 0 }
   0xd   : > { %s1157_s28 = smov (!%p336_p3, %s894_s28), 3  ;;  %439 = vmatpush1.bf16.msra.mxu0 %v959_v7  ;;  %482 = vmatpush1.bf16.msra.mxu1 %v960_v8 }
   0xe   : > { %s895_s20 = sshll.u32 %s1157_s28, 2  ;;  %923 = vmatprep.subr.msk.bf16.mxu0 %vm541_vm0, %v920_v11  ;;  %925 = vmatprep.subr.msk.bf16.mxu1 %vm541_vm0, %v922_v13  ;;  %s899_s10 = sshll.u32 %s1157_s28, 3 }
   0xf   : > { %s339_s29 = scalar_lea.vmem %s1148_s0, %s895_s20  ;;  %s345_s9 = scalar_lea.vmem %s1149_s1, %s895_s20 }
  0x10   : > { %v961_v15 = vld [vmem:[%s345_s9] sm:$0xff]   ;;  %s1075_s13 = scalar_lea.vmem %s1152_s4, %s899_s10  ;;  %s357_s16 = scalar_lea.vmem %s1153_s5, %s899_s10 }
  0x11   : > { %916 = vmatmul.mubr.msk.bf16.vlgmr.msra.gmra.mrb[0].mxu0 %vm432_vm1, %v961_v15  ;;  %917 = vmatmul.mubr.msk.bf16.vlgmr.msra.gmra.mrb[0].mxu1 %vm432_vm1, %v961_v15  ;;  %v700_v18 = vld [vmem:[%s1075_s13 + $0x8] sm:$0xff]  ;;  %v719_v19 = vld [vmem:[%s357_s16] sm:$0xff]  ;;  %s1084_s19 = scalar_lea.vmem %s1154_s6, %s899_s10  ;;  %s929_s20 = sshll.u32 %s1157_s28, 5 }
  0x12   : > { %555 = vmatpush1.bf16.msra.mxu0 %v543_v16  ;;  %598 = vmatpush1.bf16.msra.mxu1 %v549_v17  ;;  %v966_v20 = vld [vmem:[%s339_s29] sm:$0xff]   ;;  %v720_v21 = vld [vmem:[%s357_s16 + $0x8] sm:$0xff]  ;;  %s370_s23 = scalar_lea.vmem %s1155_s7, %s929_s20 }
  0x13   : > { %586 = vmatprep.mubr.bf16.mxu0 %v979_v2  ;;  %629 = vmatprep.mubr.bf16.mxu1 %v979_v2  ;;  %v747_v22 = vld [vmem:[%s1084_s19] sm:$0xff]  ;;  %v748_v51 = vld [vmem:[%s1084_s19 + $0x8] sm:$0xff] }
  0x14   : > { %708 = vperm.xlu1 %948, %v700_v18   ;;  %v699_v52 = vld [vmem:[%s1075_s13] sm:$0xff] }
  0x18   : > { %723 = vperm.xlu1 %948, %v719_v19  }
  0x1c   : > { %728 = vperm.xlu1 %948, %v720_v21  }
  0x1d   : > { %924 = vmatmul.mubr.msk.bf16.vlgmr.msra.gmra.mrb[0].mxu0 %vm537_vm2, %v966_v20  ;;  %926 = vmatmul.mubr.msk.bf16.vlgmr.msra.gmra.mrb[0].mxu1 %vm537_vm2, %v966_v20 }
  0x20   : > { %751 = vperm.xlu1 %948, %v747_v22  }
  0x93   : > { %v709_v53 = vpop.permute.xlu1 %708 }
  0x97   : > { %v724_v54 = vpop.permute.xlu1 %723 }
  0x9b   : > { %v729_v55 = vpop.permute.xlu1 %728 }
  0x9f   : > { %v752_v56 = vpop.permute.xlu1 %751 }
  0xf0   : > { %v1087_v23 = vpop.f32.mrb[0].mxu0  ;;  %v1089_v24 = vpop.f32.mrb[0].mxu1 }
  0xf1   : > { %v653_v25 = vmul.f32 %v1087_v23, %v1087_v23  ;;  %v1093_v26 = vpop.f32.mrb[1].mxu0  ;;  %v1095_v27 = vpop.f32.mrb[1].mxu1  ;;  %v655_v38 = vmul.f32 %v1089_v24, %v1089_v24 }
  0xf2   : > { %v640_v28 = vadd.f32 %v1093_v26, %v1087_v23  ;;  %v654_v29 = vmul.f32 %v1093_v26, %v1093_v26  ;;  %v1101_v30 = vpop.f32.mrb[2].mxu0  ;;  %v1103_v31 = vpop.f32.mrb[2].mxu1  ;;  %v656_v44 = vmul.f32 %v1095_v27, %v1095_v27 }
  0xf3   : > { %v657_v32 = vmul.f32 %v1101_v30, %v1101_v30  ;;  %v1107_v33 = vpop.f32.mrb[3].mxu0  ;;  %v1109_v34 = vpop.f32.mrb[3].mxu1  ;;  %v659_v40 = vmul.f32 %v1103_v31, %v1103_v31 }
  0xf4   : > { %v645_v35 = vadd.f32 %v1107_v33, %v1101_v30  ;;  %v658_v36 = vmul.f32 %v1107_v33, %v1107_v33  ;;  %v641_v37 = vadd.f32 %v640_v28, %v1089_v24  ;;  %v661_v39 = vadd.f32 %v654_v29, %v653_v25 }
  0xf5   : > { %v660_v46 = vmul.f32 %v1109_v34, %v1109_v34 }
  0xf6   : > { %v666_v41 = vadd.f32 %v658_v36, %v657_v32  ;;  %v642_v42 = vadd.f32 %v641_v37, %v1095_v27  ;;  %v646_v43 = vadd.f32 %v645_v35, %v1103_v31  ;;  %v662_v45 = vadd.f32 %v661_v39, %v655_v38 }
  0xf8   : > { %643 = vadd.xlane.f32.xlu0 %v642_v42  ;;  %v647_v47 = vadd.f32 %v646_v43, %v1109_v34  ;;  %v667_v48 = vadd.f32 %v666_v41, %v659_v40  ;;  %v663_v49 = vadd.f32 %v662_v45, %v656_v44 }
  0xfa   : > { %v668_v50 = vadd.f32 %v667_v48, %v660_v46  ;;  %664 = vadd.xlane.f32.xlu1 %v663_v49 }
  0xfc   : > { %648 = vadd.xlane.f32.xlu0 %v647_v47 }
  0xfe   : > { %669 = vadd.xlane.f32.xlu1 %v668_v50 }
 0x10f   : > { %756 = vperm.xlu1 %948, %v748_v51  }
 0x112   : > { %703 = vperm.xlu0 %947, %v699_v52  }
 0x185   : > { %v644_v57 = vpop.xlane.xlu0 %643 }
 0x186   : > { %v651_v58 = vmul.f32 0.001953125, %v644_v57 }
 0x187   : > { %v665_v59 = vpop.xlane.xlu1 %664 }
 0x188   : > { %v673_v60 = vmul.f32 %v651_v58, %v651_v58  ;;  %v671_v61 = vmul.f32 0.001953125, %v665_v59  ;;  %v679_v9 = vsub.f32 %v1087_v23, %v651_v58  ;;  %v680_v10 = vsub.f32 %v1093_v26, %v651_v58 }
 0x189   : > { %v649_v62 = vpop.xlane.xlu0 %648  ;;  %v681_v11 = vsub.f32 %v1089_v24, %v651_v58  ;;  %v682_v12 = vsub.f32 %v1095_v27, %v651_v58 }
 0x18a   : > { %v652_v63 = vmul.f32 0.001953125, %v649_v62  ;;  %v675_v0 = vsub.f32 %v671_v61, %v673_v60 }
 0x18b   : > { %v670_v1 = vpop.xlane.xlu1 %669 }
 0x18c   : > { %v677_v2 = vmax.f32 %v675_v0, 0.0  ;;  %v672_v3 = vmul.f32 0.001953125, %v670_v1  ;;  %v674_v4 = vmul.f32 %v652_v63, %v652_v63  ;;  %v683_v19 = vsub.f32 %v1101_v30, %v652_v63 }
 0x18d   : > { %v684_v20 = vsub.f32 %v1107_v33, %v652_v63  ;;  %v685_v21 = vsub.f32 %v1103_v31, %v652_v63  ;;  %v686_v22 = vsub.f32 %v1109_v34, %v652_v63 }
 0x18e   : > { %v687_v5 = vadd.f32 1e-05, %v677_v2  ;;  %v676_v6 = vsub.f32 %v672_v3, %v674_v4 }
 0x18f   : > { %v757_v48 = vpop.permute.xlu1 %756 }
 0x190   : > { %967 = vrsqrt.f32 %v687_v5  ;;  %v678_v7 = vmax.f32 %v676_v6, 0.0 }
 0x191   : > { %v704_v14 = vpop.permute.xlu0 %703 }
 0x192   : > { %v688_v8 = vadd.f32 1e-05, %v678_v7 }
 0x194   : > { %969 = vrsqrt.f32 %v688_v8 }
 0x19a   : > { %v968_v13 = vpop.eup %967 }
 0x19b   : > { %v691_v15 = vmul.f32 %v968_v13, %v679_v9  ;;  %v692_v16 = vmul.f32 %v968_v13, %v680_v10  ;;  %v693_v17 = vmul.f32 %v968_v13, %v681_v11  ;;  %v694_v18 = vmul.f32 %v968_v13, %v682_v12 }
 0x19d   : > { %v711_v23 = vmul.f32 %v704_v14, %v691_v15  ;;  %v712_v25 = vmul.f32 %v704_v14, %v692_v16  ;;  %v713_v24 = vmul.f32 %v704_v14, %v693_v17  ;;  %v714_v26 = vmul.f32 %v704_v14, %v694_v18 }
 0x19e   : > { %v970_v27 = vpop.eup %969 }
 0x19f   : > { %v695_v28 = vmul.f32 %v970_v27, %v683_v19  ;;  %v696_v29 = vmul.f32 %v970_v27, %v684_v20  ;;  %v697_v32 = vmul.f32 %v970_v27, %v685_v21  ;;  %v698_v35 = vmul.f32 %v970_v27, %v686_v22 }
 0x1a0   : > { %v731_v36 = vadd.f32 %v724_v54, %v711_v23  ;;  %v732_v37 = vadd.f32 %v724_v54, %v712_v25  ;;  %v733_v38 = vadd.f32 %v724_v54, %v713_v24  ;;  %v734_v30 = vadd.f32 %v724_v54, %v714_v26 }
 0x1a1   : > { %v715_v39 = vmul.f32 %v709_v53, %v695_v28  ;;  %v716_v33 = vmul.f32 %v709_v53, %v696_v29  ;;  %v717_v40 = vmul.f32 %v709_v53, %v697_v32  ;;  %v718_v31 = vmul.f32 %v709_v53, %v698_v35 }
 0x1a2   : > { %vm739_vm3 = vcmp.ge.f32.partialorder %v731_v36, 0.0  ;;  %vm740_vm4 = vcmp.ge.f32.partialorder %v732_v37, 0.0  ;;  %vm741_vm5 = vcmp.ge.f32.partialorder %v733_v38, 0.0  ;;  %vm742_vm6 = vcmp.ge.f32.partialorder %v734_v30, 0.0 }
 0x1a3   : > { %v735_v34 = vadd.f32 %v729_v55, %v715_v39  ;;  %v736_v41 = vadd.f32 %v729_v55, %v716_v33  ;;  %v737_v42 = vadd.f32 %v729_v55, %v717_v40  ;;  %v738_v43 = vadd.f32 %v729_v55, %v718_v31 }
 0x1a4   : > { %v759_v44 = vmul.f32 %v752_v56, %v731_v36  ;;  %v760_v45 = vmul.f32 %v752_v56, %v732_v37  ;;  %v761_v46 = vmul.f32 %v752_v56, %v733_v38  ;;  %v762_v47 = vmul.f32 %v752_v56, %v734_v30 }
 0x1a5   : > { %vm743_vm7 = vcmp.ge.f32.partialorder %v735_v34, 0.0  ;;  %vm744_vm8 = vcmp.ge.f32.partialorder %v736_v41, 0.0  ;;  %vm745_vm9 = vcmp.ge.f32.partialorder %v737_v42, 0.0  ;;  %vm746_vm10 = vcmp.ge.f32.partialorder %v738_v43, 0.0 }
 0x1a6   : > { %v763_v49 = vmul.f32 %v757_v48, %v735_v34  ;;  %v764_v50 = vmul.f32 %v757_v48, %v736_v41  ;;  %v765_v51 = vmul.f32 %v757_v48, %v737_v42  ;;  %v766_v52 = vmul.f32 %v757_v48, %v738_v43 }
 0x1a7   : > { %v767_v53 = vsel %vm739_vm3, %v731_v36, %v759_v44  ;;  %v768_v54 = vsel %vm740_vm4, %v732_v37, %v760_v45  ;;  %v769_v55 = vsel %vm741_vm5, %v733_v38, %v761_v46  ;;  %v770_v56 = vsel %vm742_vm6, %v734_v30, %v762_v47 }
 0x1a8   : > { %v771_v57 = vsel %vm743_vm7, %v735_v34, %v763_v49  ;;  %v772_v58 = vsel %vm744_vm8, %v736_v41, %v764_v50  ;;  %v773_v59 = vsel %vm745_vm9, %v737_v42, %v765_v51  ;;  %v774_v60 = vsel %vm746_vm10, %v738_v43, %v766_v52  ;;  %775 = vst [vmem:[%s370_s23] sm:$0xff] %v767_v53 }
 0x1a9   : > { %776 = vst [vmem:[%s370_s23 + $0x8] sm:$0xff] %v768_v54  ;;  %777 = vst [vmem:[%s370_s23 + $0x10] sm:$0xff] %v769_v55 }
 0x1aa   : > { %778 = vst [vmem:[%s370_s23 + $0x18] sm:$0xff] %v770_v56  ;;  %779 = vst [vmem:[%s370_s23 + $0x20] sm:$0xff] %v771_v57 }
 0x1ab   : > { %780 = vst [vmem:[%s370_s23 + $0x28] sm:$0xff] %v772_v58  ;;  %781 = vst [vmem:[%s370_s23 + $0x30] sm:$0xff] %v773_v59 }
 0x1ac   : > { %782 = vst [vmem:[%s370_s23 + $0x38] sm:$0xff] %v774_v60 }
 0x1ad PF: > { %s17_s24 = sadd.s32 1, %s977_s24  }
 0x1ae   : > { %p14_p4 = scmp.ge.s32.totalorder %s17_s24, 4  }
 0x1b0   :  { %16 = sbr.rel (!%p14_p4) target bundleno = 1 (0x1), region = 90 }

// kernel: psp_forward.2
= control target key start
LH: loop header
LB: loop body
LE: loop exit
PB: predicated region body
PF: predicated region fallthrough
CT: control target
= control target key end

     0   :  { %15 = vsyncpa [#allocation3], 0  ;;  %s4921_s13 = smov 0   ;;  %s4923_s14 = smov 0   ;;  %s5914_s0 = inlined_call_operand.vmem [shape: f32[16,256], index: 0, kind: input, shape index: {}]   ;;  %s5915_s1 = inlined_call_operand.vmem [shape: f32[16,36], index: 1, kind: input, shape index: {}]   ;;  %s5916_s2 = inlined_call_operand.vmem [shape: f32[256,64], index: 2, kind: input, shape index: {}]   ;;  %s5917_s3 = inlined_call_operand.vmem [shape: f32[64,16], index: 3, kind: input, shape index: {}]   ;;  %s5918_s4 = inlined_call_operand.vmem [shape: f32[16,8], index: 4, kind: input, shape index: {}]   ;;  %s5919_s5 = inlined_call_operand.vmem [shape: f32[8,8], index: 5, kind: input, shape index: {}]   ;;  %s5920_s6 = inlined_call_operand.vmem [shape: f32[9,64,256], index: 6, kind: input, shape index: {}]   ;;  %s5921_s7 = inlined_call_operand.vmem [shape: f32[9,16,256], index: 7, kind: input, shape index: {}]   ;;  %s5922_s8 = inlined_call_operand.hbm [shape: f32[9,8,256], index: 8, kind: input, shape index: {}]   ;;  %s5923_s9 = inlined_call_operand.vmem [shape: f32[9,8,256], index: 9, kind: input, shape index: {}]   ;;  %s5924_s10 = inlined_call_operand.vmem [shape: bf16[4,16,256], index: 10, kind: output, shape index: {}]  }
   0x1   :  { %s4925_s15 = smov 0  }
   0x2 LB: > { %s4934_s16 = sadd.s32 4294967295, %s4822_s15   ;;  %s4936_s17 = sadd.s32 1, %s4822_s15   ;;  %s4822_s15 = sphi %s4925_s15, %s5936_s15   ;;  %s4818_s14 = sphi %s4923_s14, %s5935_s14   ;;  %s4814_s13 = sphi %s4921_s13, %s5934_s13  }
   0x3   : > { %s245_s18 = ssub.s32 %s4822_s15, %s4936_s17  ;;  %s248_s19 = sadd.s32 1, %s4818_s14 }
   0x4   : > { %p246_p0 = scmp.eq.s32.totalorder %s245_s18, 0  ;;  %p258_p1 = scmp.ne.s32.totalorder %s4818_s14, %s4814_s13 }
   0x5   : > { %p259_p2 = scmp.eq.s32.totalorder %s4934_s16, 1  ;;  %p4042_p3 = scmp.ge.s32.totalorder %s4822_s15, 1 }
   0x6   : > { %s4944_s20 = scalar_select %p246_p0, %s4818_s14, %s248_s19  }
   0x7   : > { %p4946_p4 = por %p259_p2, %p258_p1  ;;  %p272_p5 = scmp.lt.s32.totalorder %s4822_s15, 3 }
   0x8   : > { %p5925_p6 = scmp.eq.s32.totalorder %s4934_s16, 0  ;;  %s4824_s23 = smov [#allocation2]  }
   0x9   : > { %s5927_s21 = scalar_select %p4946_p4, 1, 0 }
   0xa   : > { %p4951_p7 = pnand %p4042_p3, %p272_p5  ;;  %s302_s24 = sshll.u32 %s4824_s23, 4  ;;  %s303_s24 = int_to_ptr.vmem [resolvable:$true] %s302_s24 }
   0xb   : > { %s4768_s28 = scalar_lea.hbm %s5922_s8, 2304 }
   0xc   : > { %s5928_s22 = scalar_select %p4951_p7, 1, 0 }
   0xd   : > { %p4659_p8 = pneg %p4951_p7  ;;  %p4769_p10 = scmp.ne.s32.totalorder %s5922_s8, %s4768_s28 }
   0xe   : > { %p4775_p0 = scmp.lt.u32.totalorder %s4768_s28, %s5922_s8 }
   0xf   : > { %p4959_p9 = pnand %p5925_p6, %p4659_p8 }
  0x11   : > { %p4770_p11 = pneg %p4959_p9 }
  0x13   : > { %p4771_p12 = pnand %p4770_p11, %p4769_p10 }
  0x15   : > { %p4772_p13 = pneg %p4771_p12 }
  0x17   : > { %p4777_p1 = pnand %p4775_p0, %p4772_p13 }
  0x19   : > { %4780 = shalt.err (!%p4777_p1)
}
  0x1a   : > { %s4781_s15 = scalar_lea.vmem %s303_s24, 2304  ;;  %p4789_p8 = scmp.lt.s32.totalorder %s303_s24, %s303_s24 }
  0x1b   : > { %p4782_p2 = scmp.ne.s32.totalorder %s303_s24, %s4781_s15  ;;  %p4790_p6 = scmp.lt.s32.totalorder %s4781_s15, %s4781_s15 }
  0x1d   : > { %p4784_p3 = pnand %p4782_p2, %p4770_p11  ;;  %p4791_p4 = por %p4790_p6, %p4789_p8 }
  0x1f   : > { %p4785_p5 = pneg %p4784_p3 }
  0x21   : > { %p4792_p7 = pnand %p4791_p4, %p4785_p5 }
  0x23   : > { %4795 = shalt.err (!%p4792_p7)
}
  0x24   : > { %s4825_s18 = smov 256   ;;  %s4826_s19 = smov 16  }
  0x25   : > { %4662 = dma.hbm_to_vmem [thread:$0]  (!%p4959_p9), %s5922_s8, 2304, %s303_s24, [#allocation3], %s4825_s18, %s4825_s18, %s4826_s19  }
  0x26   : > { %p5930_p10 = scmp.ne.s32.totalorder %s5928_s22, 0 }
  0x27   : > { %p5931_p12 = scmp.eq.s32.totalorder (!%p5930_p10), %s4934_s16, 0 }
  0x28   : > { %336 = sbr.rel (%p5930_p10) target bundleno = 1510 (0x5e6), region = 60 }
  0x2f   : > { %4809 = dma.done.wait (%p5931_p12), [#allocation3], 2304   ;;  %p5932_p11 = pmov %p5931_p12 }
  0x30   : > { %v4827_v0 = vmov 2   ;;  %v4828_v1 = vmov 1   ;;  %p377_p4 = scmp.lt.s32.totalorder %s4934_s16, 1  ;;  %v405_v2 = vld [vmem:[%s5916_s2 + $0x80] sm:$0xff]  ;;  %v406_v3 = vld [vmem:[%s5916_s2 + $0x88] sm:$0xff]  ;;  %v407_v7 = vld [vmem:[%s5916_s2 + $0x90] sm:$0xff] }
  0x31   : > { %4811 = vsyncadd (%p5932_p11), [#allocation3], 4294964992  ;;  %4733 = vset.pattern.permute.xlu1 %v4827_v0  ;;  %4731 = vset.pattern.permute.xlu0 %v4828_v1  ;;  %v389_v4 = vld [vmem:[%s5916_s2] sm:$0xff]  ;;  %v4364_v5 = vpack.c.bf16 %v406_v3, %v405_v2  ;;  %v390_v6 = vld [vmem:[%s5916_s2 + $0x8] sm:$0xff]  ;;  %v4829_v40 = vmov 3   ;;  %v4830_v41 = vmov 0  }
  0x32   : > { %v408_v8 = vld [vmem:[%s5916_s2 + $0x98] sm:$0xff]  ;;  %s378_s23 = scalar_select %p377_p4, %s4934_s16, 1  ;;  %v4366_v9 = vpack.c.bf16 %v390_v6, %v389_v4  ;;  %v391_v11 = vld [vmem:[%s5916_s2 + $0x10] sm:$0xff]  ;;  %v409_v13 = vld [vmem:[%s5916_s2 + $0xa0] sm:$0xff]  ;;  %v4831_v56 = vmov 4   ;;  %v4832_v3 = vmov 5  }
  0x33   : > { %v4368_v10 = vpack.c.bf16 %v408_v8, %v407_v7  ;;  %v392_v12 = vld [vmem:[%s5916_s2 + $0x18] sm:$0xff]  ;;  %4365 = vmatprep.subr.bf16.mxu0 %v4364_v5  ;;  %v410_v14 = vld [vmem:[%s5916_s2 + $0xa8] sm:$0xff]  ;;  %v393_v17 = vld [vmem:[%s5916_s2 + $0x20] sm:$0xff]  ;;  %vm535_vm0 = vcmask 523264   ;;  %vm4847_vm1 = vmmov 0   ;;  %s374_s22 = sand.u32 1, %s4814_s13  }
  0x34   : > { %4367 = vmatpush3.bf16.msra.mxu0 %v4366_v9  ;;  %v4370_v15 = vpack.c.bf16 %v392_v12, %v391_v11  ;;  %s4050_s11 = sshll.u32 %s378_s23, 3  ;;  %v4372_v16 = vpack.c.bf16 %v410_v14, %v409_v13  ;;  %v394_v18 = vld [vmem:[%s5916_s2 + $0x28] sm:$0xff]  ;;  %s4278_s26 = sshll.u32 %s378_s23, 4  ;;  %v411_v19 = vld [vmem:[%s5916_s2 + $0xb0] sm:$0xff]  ;;  %v412_v20 = vld [vmem:[%s5916_s2 + $0xb8] sm:$0xff]  ;;  %v4833_v9 = vmov 6  }
  0x35   : > { %4369 = vmatprep.subr.bf16.mxu0 %v4368_v10  ;;  %s5032_s30 = scalar_lea.vmem %s5915_s1, %s4050_s11  ;;  %v4374_v21 = vpack.c.bf16 %v394_v18, %v393_v17  ;;  %s5037_s23 = scalar_lea.vmem %s5914_s0, %s4278_s26  ;;  %v4376_v22 = vpack.c.bf16 %v412_v20, %v411_v19  ;;  %v395_v23 = vld [vmem:[%s5916_s2 + $0x30] sm:$0xff]  ;;  %v396_v24 = vld [vmem:[%s5916_s2 + $0x38] sm:$0xff]  ;;  %v413_v25 = vld [vmem:[%s5916_s2 + $0xc0] sm:$0xff]  ;;  %v4834_v10 = vmov 8   ;;  %v4835_v12 = vmov 7  }
  0x36   : > { %v414_v26 = vld [vmem:[%s5916_s2 + $0xc8] sm:$0xff]  ;;  %v5052_v27 = vld [vmem:[%s5032_s30] sm:$0xff]  ;;  %v4378_v30 = vpack.c.bf16 %v396_v24, %v395_v23  ;;  %v4054_v31 = vld [vmem:[%s5920_s6 + $0x98] sm:$0xff]  ;;  %v4836_v23 = vmov 0.0   ;;  %s4047_s28 = sshll.u32 %s374_s22, 5  ;;  %vm1479_vm2 = vcmask 130048  }
  0x37   : > { %v388_v28 = vld [vmem:[%s5037_s23 + $0x8] sm:$0xff]  ;;  %685 = vperm.xlu1 %4733, %v5052_v27   ;;  %514 = vperm.xlu0 %4731, %v5052_v27   ;;  %v4051_v32 = vld [vmem:[%s5920_s6 + $0x80] sm:$0xff]  ;;  %v4053_v33 = vld [vmem:[%s5920_s6 + $0x90] sm:$0xff]  ;;  %v4380_v34 = vpack.c.bf16 %v414_v26, %v413_v25  ;;  %vm2330_vm3 = vcmask 64512   ;;  %p5933_p6 = scmp.ne.s32.totalorder %s5927_s21, 0 }
  0x38   : > { %4371 = vmatpush3.bf16.msra.mxu0 %v4370_v15  ;;  %v4052_v29 = vld [vmem:[%s5920_s6 + $0x88] sm:$0xff]  ;;  %485 = vmatprep.mubr.f32.mxu0 %v388_v28  ;;  %v397_v35 = vld [vmem:[%s5916_s2 + $0x40] sm:$0xff]  ;;  %v415_v37 = vld [vmem:[%s5916_s2 + $0xd0] sm:$0xff]  ;;  %v4398_v42 = vpack.c.bf16 %v4053_v33, %v4051_v32  ;;  %s4283_s27 = sshll.u32 (%p5933_p6), %s4934_s16, 3 }
  0x39   : > { %4373 = vmatprep.subr.bf16.mxu0 %v4372_v16  ;;  %v398_v36 = vld [vmem:[%s5916_s2 + $0x48] sm:$0xff]  ;;  %v416_v38 = vld [vmem:[%s5916_s2 + $0xd8] sm:$0xff]  ;;  %v4396_v39 = vpack.c.bf16 %v4054_v31, %v4052_v29  ;;  %v4055_v46 = vld [vmem:[%s5920_s6 + $0xa0] sm:$0xff]  ;;  %603 = vmatprep.mubr.f32.mxu1 %v4836_v23  ;;  %s3921_s22 = scalar_lea.vmem (%p5933_p6), %s5924_s10, %s4283_s27 }
  0x3a   : > { %v4056_v43 = vld [vmem:[%s5920_s6 + $0xa8] sm:$0xff]  ;;  %v4058_v44 = vld [vmem:[%s5920_s6 + $0xb8] sm:$0xff]  ;;  %v4382_v45 = vpack.c.bf16 %v398_v36, %v397_v35  ;;  %v4057_v47 = vld [vmem:[%s5920_s6 + $0xb0] sm:$0xff]  ;;  %v4384_v48 = vpack.c.bf16 %v416_v38, %v415_v37 }
  0x3b   : > { %4734 = vset.pattern.permute.xlu1 %v4829_v40  ;;  %4732 = vset.pattern.permute.xlu0 %v4830_v41  ;;  %v399_v49 = vld [vmem:[%s5916_s2 + $0x50] sm:$0xff]  ;;  %v400_v50 = vld [vmem:[%s5916_s2 + $0x58] sm:$0xff]  ;;  %v417_v51 = vld [vmem:[%s5916_s2 + $0xe0] sm:$0xff]  ;;  %v4400_v53 = vpack.c.bf16 %v4058_v44, %v4056_v43  ;;  %v4402_v54 = vpack.c.bf16 %v4057_v47, %v4055_v46 }
  0x3c   : > { %4375 = vmatpush3.bf16.msra.mxu0 %v4374_v21  ;;  %783 = vperm.xlu1 %4734, %v5052_v27   ;;  %v418_v52 = vld [vmem:[%s5916_s2 + $0xe8] sm:$0xff]  ;;  %v4386_v55 = vpack.c.bf16 %v400_v50, %v399_v49  ;;  %v4062_v58 = vld [vmem:[%s5920_s6 + $0xd8] sm:$0xff]  ;;  %v4059_v59 = vld [vmem:[%s5920_s6 + $0xc0] sm:$0xff] }
  0x3d   : > { %4377 = vmatprep.subr.bf16.mxu0 %v4376_v22  ;;  %493 = vperm.xlu0 %4732, %v5052_v27   ;;  %v4060_v57 = vld [vmem:[%s5920_s6 + $0xc8] sm:$0xff]  ;;  %v4388_v60 = vpack.c.bf16 %v418_v52, %v417_v51  ;;  %v401_v61 = vld [vmem:[%s5916_s2 + $0x60] sm:$0xff]  ;;  %v4061_v0 = vld [vmem:[%s5920_s6 + $0xd0] sm:$0xff] }
  0x3e   : > { %4397 = vmatprep.subr.bf16.mxu1 %v4396_v39  ;;  %v402_v62 = vld [vmem:[%s5916_s2 + $0x68] sm:$0xff]  ;;  %v4404_v63 = vpack.c.bf16 %v4062_v58, %v4060_v57  ;;  %v419_v1 = vld [vmem:[%s5916_s2 + $0xf0] sm:$0xff]  ;;  %v420_v2 = vld [vmem:[%s5916_s2 + $0xf8] sm:$0xff]  ;;  %v4406_v4 = vpack.c.bf16 %v4061_v0, %v4059_v59 }
  0x3f   : > { %4399 = vmatpush1.bf16.msra.mxu1 %v4398_v42  ;;  %v4390_v5 = vpack.c.bf16 %v402_v62, %v401_v61  ;;  %v4392_v6 = vpack.c.bf16 %v420_v2, %v419_v1  ;;  %v403_v7 = vld [vmem:[%s5916_s2 + $0x70] sm:$0xff]  ;;  %v404_v8 = vld [vmem:[%s5916_s2 + $0x78] sm:$0xff]  ;;  %v387_v13 = vld [vmem:[%s5037_s23] sm:$0xff]  ;;  %s5638_s23 = scalar_lea.vmem [#allocation4], %s4047_s28 }
  0x40   : > { %4379 = vmatpush3.bf16.msra.mxu0 %v4378_v30  ;;  %4735 = vset.pattern.permute.xlu1 %v4831_v56  ;;  %v4394_v11 = vpack.c.bf16 %v404_v8, %v403_v7  ;;  %v4064_v14 = vld [vmem:[%s5920_s6 + $0xe8] sm:$0xff]  ;;  %v4066_v15 = vld [vmem:[%s5920_s6 + $0xf8] sm:$0xff]  ;;  %v4063_v17 = vld [vmem:[%s5920_s6 + $0xe0] sm:$0xff] }
  0x41   : > { %4381 = vmatprep.subr.bf16.mxu0 %v4380_v34  ;;  %881 = vperm.xlu1 %4735, %v5052_v27   ;;  %v4408_v16 = vpack.c.bf16 %v4066_v15, %v4064_v14  ;;  %v4065_v18 = vld [vmem:[%s5920_s6 + $0xf0] sm:$0xff]  ;;  %v498_v20 = vld [vmem:[%s5920_s6 + $0x8] sm:$0xff]  ;;  %v500_v21 = vld [vmem:[%s5920_s6 + $0x18] sm:$0xff] }
  0x42   : > { %4736 = vset.pattern.permute.xlu0 %v4832_v3  ;;  %4401 = vmatprep.subr.bf16.mxu1 %v4400_v53  ;;  %v4410_v19 = vpack.c.bf16 %v4065_v18, %v4063_v17  ;;  %v4412_v22 = vpack.c.bf16 %v500_v21, %v498_v20  ;;  %v497_v25 = vld [vmem:[%s5920_s6] sm:$0xff]  ;;  %v499_v26 = vld [vmem:[%s5920_s6 + $0x10] sm:$0xff]  ;;  %v502_v29 = vld [vmem:[%s5920_s6 + $0x28] sm:$0xff]  ;;  %v4840_v17 = vmov 14  }
  0x43   : > { %979 = vperm.xlu0 %4736, %v5052_v27   ;;  %4403 = vmatpush1.bf16.msra.mxu1 %v4402_v54  ;;  %v504_v30 = vld [vmem:[%s5920_s6 + $0x38] sm:$0xff]  ;;  %v4414_v33 = vpack.c.bf16 %v499_v26, %v497_v25  ;;  %v501_v36 = vld [vmem:[%s5920_s6 + $0x20] sm:$0xff]  ;;  %v503_v37 = vld [vmem:[%s5920_s6 + $0x30] sm:$0xff]  ;;  %v4841_v25 = vmov 12  }
  0x44   : > { %4383 = vmatpush3.bf16.msra.mxu0 %v4382_v45  ;;  %4405 = vmatprep.subr.bf16.mxu1 %v4404_v63  ;;  %v4416_v35 = vpack.c.bf16 %v504_v30, %v502_v29  ;;  %v506_v38 = vld [vmem:[%s5920_s6 + $0x48] sm:$0xff]  ;;  %v508_v39 = vld [vmem:[%s5920_s6 + $0x58] sm:$0xff]  ;;  %v4418_v40 = vpack.c.bf16 %v503_v37, %v501_v36  ;;  %v505_v42 = vld [vmem:[%s5920_s6 + $0x40] sm:$0xff] }
  0x45   : > { %4385 = vmatprep.subr.bf16.mxu0 %v4384_v48  ;;  %4737 = vset.pattern.permute.xlu1 %v4833_v9  ;;  %v4420_v41 = vpack.c.bf16 %v508_v39, %v506_v38  ;;  %v507_v43 = vld [vmem:[%s5920_s6 + $0x50] sm:$0xff]  ;;  %v510_v44 = vld [vmem:[%s5920_s6 + $0x68] sm:$0xff]  ;;  %v512_v45 = vld [vmem:[%s5920_s6 + $0x78] sm:$0xff]  ;;  %v4838_v9 = vmov 11  }
  0x46   : > { %1077 = vperm.xlu1 %4737, %v5052_v27   ;;  %v4422_v46 = vpack.c.bf16 %v507_v43, %v505_v42  ;;  %v4424_v47 = vpack.c.bf16 %v512_v45, %v510_v44  ;;  %v509_v48 = vld [vmem:[%s5920_s6 + $0x60] sm:$0xff]  ;;  %v511_v49 = vld [vmem:[%s5920_s6 + $0x70] sm:$0xff]  ;;  %v4070_v50 = vld [vmem:[%s5920_s6 + $0x108] sm:$0xff] }
  0x47   : > { %4739 = vset.pattern.permute.xlu0 %v4834_v10  ;;  %4407 = vmatpush1.bf16.msra.mxu1 %v4406_v4  ;;  %v4072_v51 = vld [vmem:[%s5920_s6 + $0x118] sm:$0xff]  ;;  %v4426_v52 = vpack.c.bf16 %v511_v49, %v509_v48  ;;  %v4069_v54 = vld [vmem:[%s5920_s6 + $0x100] sm:$0xff]  ;;  %v4074_v56 = vld [vmem:[%s5920_s6 + $0x128] sm:$0xff] }
  0x48   : > { %4387 = vmatpush3.bf16.msra.mxu0 %v4386_v55  ;;  %1273 = vperm.xlu0 %4739, %v5052_v27   ;;  %v4428_v53 = vpack.c.bf16 %v4072_v51, %v4070_v50  ;;  %v4071_v55 = vld [vmem:[%s5920_s6 + $0x110] sm:$0xff]  ;;  %v4076_v57 = vld [vmem:[%s5920_s6 + $0x138] sm:$0xff]  ;;  %v4073_v62 = vld [vmem:[%s5920_s6 + $0x120] sm:$0xff]  ;;  %v4844_v50 = vmov 15  }
  0x49   : > { %4389 = vmatprep.subr.bf16.mxu0 %v4388_v60  ;;  %4409 = vmatprep.subr.bf16.mxu1 %v4408_v16  ;;  %v4430_v59 = vpack.c.bf16 %v4071_v55, %v4069_v54  ;;  %v4432_v61 = vpack.c.bf16 %v4076_v57, %v4074_v56  ;;  %v4075_v63 = vld [vmem:[%s5920_s6 + $0x130] sm:$0xff]  ;;  %v4078_v0 = vld [vmem:[%s5920_s6 + $0x148] sm:$0xff]  ;;  %v4080_v1 = vld [vmem:[%s5920_s6 + $0x158] sm:$0xff]  ;;  %v4839_v16 = vmov 9   ;;  %v4845_v57 = vmov 16  }
  0x4a   : > { %4738 = vset.pattern.permute.xlu1 %v4835_v12  ;;  %v4434_v2 = vpack.c.bf16 %v4075_v63, %v4073_v62  ;;  %v4436_v3 = vpack.c.bf16 %v4080_v1, %v4078_v0  ;;  %v4077_v4 = vld [vmem:[%s5920_s6 + $0x140] sm:$0xff]  ;;  %v4082_v7 = vld [vmem:[%s5920_s6 + $0x168] sm:$0xff]  ;;  %v4084_v8 = vld [vmem:[%s5920_s6 + $0x178] sm:$0xff] }
  0x4b   : > { %1175 = vperm.xlu1 %4738, %v5052_v27   ;;  %4411 = vmatpush1.bf16.msra.mxu1 %v4410_v19  ;;  %v4081_v12 = vld [vmem:[%s5920_s6 + $0x160] sm:$0xff]  ;;  %v4087_v14 = vld [vmem:[%s5920_s6 + $0x188] sm:$0xff]  ;;  %v4089_v15 = vld [vmem:[%s5920_s6 + $0x198] sm:$0xff] }
  0x4c   : > { %4391 = vmatpush3.bf16.msra.mxu0 %v4390_v5  ;;  %4413 = vmatprep.subr.bf16.mxu1 %v4412_v22  ;;  %v4079_v5 = vld [vmem:[%s5920_s6 + $0x150] sm:$0xff]  ;;  %v4444_v19 = vpack.c.bf16 %v4089_v15, %v4087_v14  ;;  %v4086_v20 = vld [vmem:[%s5920_s6 + $0x180] sm:$0xff]  ;;  %v4091_v22 = vld [vmem:[%s5920_s6 + $0x1a8] sm:$0xff] }
  0x4d   : > { %4393 = vmatprep.subr.bf16.mxu0 %v4392_v6  ;;  %v4837_v6 = vmov 10   ;;  %4742 = vset.pattern.permute.xlu0 %v4838_v9  ;;  %v4438_v10 = vpack.c.bf16 %v4079_v5, %v4077_v4  ;;  %v4088_v21 = vld [vmem:[%s5920_s6 + $0x190] sm:$0xff]  ;;  %v4097_v36 = vld [vmem:[%s5920_s6 + $0x1d8] sm:$0xff]  ;;  %v4094_v39 = vld [vmem:[%s5920_s6 + $0x1c0] sm:$0xff] }
  0x4e   : > { %1629 = vperm.xlu0 %4742, %v5052_v27   ;;  %v4099_v42 = vld [vmem:[%s5920_s6 + $0x1e8] sm:$0xff]  ;;  %v4101_v43 = vld [vmem:[%s5920_s6 + $0x1f8] sm:$0xff]  ;;  %v4105_v54 = vld [vmem:[%s5920_s6 + $0x210] sm:$0xff] }
  0x4f   : > { %4740 = vset.pattern.permute.xlu1 %v4837_v6  ;;  %v4456_v45 = vpack.c.bf16 %v4101_v43, %v4099_v42  ;;  %v4104_v48 = vld [vmem:[%s5920_s6 + $0x208] sm:$0xff]  ;;  %v4106_v49 = vld [vmem:[%s5920_s6 + $0x218] sm:$0xff]  ;;  %v4107_v62 = vld [vmem:[%s5920_s6 + $0x220] sm:$0xff] }
  0x50   : > { %4395 = vmatpush3.bf16.msra.mxu0 %v4394_v11  ;;  %1470 = vperm.xlu1 %4740, %v5052_v27   ;;  %v4440_v11 = vpack.c.bf16 %v4084_v8, %v4082_v7  ;;  %v4108_v55 = vld [vmem:[%s5920_s6 + $0x228] sm:$0xff]  ;;  %v4110_v56 = vld [vmem:[%s5920_s6 + $0x238] sm:$0xff]  ;;  %v4109_v63 = vld [vmem:[%s5920_s6 + $0x230] sm:$0xff] }
  0x51   : > { %v4112_v0 = vld [vmem:[%s5920_s6 + $0x248] sm:$0xff]  ;;  %v4114_v1 = vld [vmem:[%s5920_s6 + $0x258] sm:$0xff]  ;;  %v4111_v4 = vld [vmem:[%s5920_s6 + $0x240] sm:$0xff] }
  0x52   : > { %4745 = vset.pattern.permute.xlu0 %v4840_v17  ;;  %v4113_v5 = vld [vmem:[%s5920_s6 + $0x250] sm:$0xff]  ;;  %v4116_v6 = vld [vmem:[%s5920_s6 + $0x268] sm:$0xff]  ;;  %v4118_v7 = vld [vmem:[%s5920_s6 + $0x278] sm:$0xff] }
  0x53   : > { %486 = vmatmul.mubr.f32.vlgmr.msra.gmra.mrb[0].mxu0 %v387_v13  ;;  %v4083_v13 = vld [vmem:[%s5920_s6 + $0x170] sm:$0xff]  ;;  %1887 = vperm.xlu0 %4745, %v5052_v27   ;;  %v4470_v8 = vpack.c.bf16 %v4113_v5, %v4111_v4  ;;  %v4472_v9 = vpack.c.bf16 %v4118_v7, %v4116_v6  ;;  %v4140_v42 = vld [vmem:[%s5920_s6 + $0x318] sm:$0xff]  ;;  %v4154_v7 = vld [vmem:[%s5920_s6 + $0x380] sm:$0xff] }
  0x54   : > { %1547 = vmatprep.mubr.f32.mxu0 %v4836_v23  ;;  %4741 = vset.pattern.permute.xlu1 %v4839_v16  ;;  %v4442_v18 = vpack.c.bf16 %v4083_v13, %v4081_v12  ;;  %v4121_v12 = vld [vmem:[%s5920_s6 + $0x288] sm:$0xff]  ;;  %v4123_v13 = vld [vmem:[%s5920_s6 + $0x298] sm:$0xff]  ;;  %v4120_v16 = vld [vmem:[%s5920_s6 + $0x280] sm:$0xff] }
  0x55   : > { %1461 = vperm.xlu1 %4741, %v5052_v27   ;;  %v4476_v15 = vpack.c.bf16 %v4123_v13, %v4121_v12  ;;  %v4122_v17 = vld [vmem:[%s5920_s6 + $0x290] sm:$0xff]  ;;  %v4157_v4 = vld [vmem:[%s5920_s6 + $0x398] sm:$0xff] }
  0x59   : > { %4743 = vset.pattern.permute.xlu1 %v4841_v25  ;;  %v4124_v25 = vld [vmem:[%s5920_s6 + $0x2a0] sm:$0xff] }
  0x5a   : > { %1715 = vperm.xlu1 %4743, %v5052_v27  }
  0xb6   : > { %v515_v32 = vpop.permute.xlu0 %514  ;;  %v686_v26 = vpop.permute.xlu1 %685 }
  0xbc   : > { %v494_v58 = vpop.permute.xlu0 %493 }
 0x126   : > { %v4316_v24 = vpop.f32.mrb[0].mxu0 }
 0x127   : > { %v4317_v28 = vpop.f32.mrb[1].mxu0 }
 0x128   : > { %v5175_v31 = vadd.f32 %v4317_v28, %v4316_v24  ;;  %v4093_v24 = vld [vmem:[%s5920_s6 + $0x1b8] sm:$0xff]  ;;  %v4446_v28 = vpack.c.bf16 %v4088_v21, %v4086_v20  ;;  %v4478_v21 = vpack.c.bf16 %v4122_v17, %v4120_v16  ;;  %v4160_v16 = vld [vmem:[%s5920_s6 + $0x3b0] sm:$0xff]  ;;  %v4163_v17 = vld [vmem:[%s5920_s6 + $0x3c8] sm:$0xff] }
 0x129   : > { %v4448_v30 = vpack.c.bf16 %v4093_v24, %v4091_v22 }
 0x12a   : > { %v517_v34 = vmul.f32 %v5175_v31, %v515_v32  ;;  %v496_v60 = vmul.f32 %v5175_v31, %v494_v58  ;;  %v688_v29 = vmul.f32 %v5175_v31, %v686_v26  ;;  %v4090_v32 = vld [vmem:[%s5920_s6 + $0x1a0] sm:$0xff]  ;;  %v784_v58 = vpop.permute.xlu1 %783  ;;  %v4126_v26 = vld [vmem:[%s5920_s6 + $0x2b0] sm:$0xff] }
 0x12c   : > { %4067 = vmatmul.mubr.msk.f32.vlgmr.msra.gmra.mrb[0].mxu1 %vm535_vm0, %v517_v34  ;;  %v4842_v34 = vmov 17  }
 0x12d   : > { %4415 = vmatpush1.bf16.msra.mxu1 %v4414_v33  ;;  %677 = vmatprep.mubr.f32.mxu1 %v4836_v23  ;;  %v4092_v33 = vld [vmem:[%s5920_s6 + $0x1b0] sm:$0xff] }
 0x12e   : > { %4417 = vmatprep.subr.bf16.mxu1 %v4416_v35  ;;  %4748 = vset.pattern.permute.xlu0 %v4842_v34  ;;  %v4095_v35 = vld [vmem:[%s5920_s6 + $0x1c8] sm:$0xff]  ;;  %v4450_v37 = vpack.c.bf16 %v4092_v33, %v4090_v32  ;;  %v882_v20 = vpop.permute.xlu1 %881  ;;  %v4128_v33 = vld [vmem:[%s5920_s6 + $0x2c0] sm:$0xff]  ;;  %v4130_v34 = vld [vmem:[%s5920_s6 + $0x2d0] sm:$0xff] }
 0x12f   : > { %2145 = vperm.xlu0 %4748, %v5052_v27   ;;  %v4452_v38 = vpack.c.bf16 %v4097_v36, %v4095_v35  ;;  %v884_v22 = vmul.f32 %v5175_v31, %v882_v20  ;;  %v4133_v35 = vld [vmem:[%s5920_s6 + $0x2e8] sm:$0xff]  ;;  %v4135_v36 = vld [vmem:[%s5920_s6 + $0x2f8] sm:$0xff] }
 0x131   : > { %4419 = vmatpush1.bf16.msra.mxu1 %v4418_v40  ;;  %v4096_v40 = vld [vmem:[%s5920_s6 + $0x1d0] sm:$0xff] }
 0x132   : > { %4421 = vmatprep.subr.bf16.mxu1 %v4420_v41  ;;  %v4843_v41 = vmov 13   ;;  %v4454_v44 = vpack.c.bf16 %v4096_v40, %v4094_v39  ;;  %v4132_v39 = vld [vmem:[%s5920_s6 + $0x2e0] sm:$0xff]  ;;  %v4134_v40 = vld [vmem:[%s5920_s6 + $0x2f0] sm:$0xff] }
 0x133   : > { %4744 = vset.pattern.permute.xlu1 %v4843_v41  ;;  %v4138_v41 = vld [vmem:[%s5920_s6 + $0x308] sm:$0xff]  ;;  %v4490_v43 = vpack.c.bf16 %v4134_v40, %v4132_v39  ;;  %v4178_v40 = vld [vmem:[%s5920_s6 + $0x438] sm:$0xff] }
 0x134   : > { %1801 = vperm.xlu1 %4744, %v5052_v27   ;;  %v4176_v39 = vld [vmem:[%s5920_s6 + $0x428] sm:$0xff] }
 0x135   : > { %4423 = vmatpush1.bf16.msra.mxu1 %v4422_v46  ;;  %v4098_v46 = vld [vmem:[%s5920_s6 + $0x1e0] sm:$0xff] }
 0x136   : > { %4425 = vmatprep.subr.bf16.mxu1 %v4424_v47  ;;  %v4100_v47 = vld [vmem:[%s5920_s6 + $0x1f0] sm:$0xff] }
 0x137   : > { %v4458_v51 = vpack.c.bf16 %v4100_v47, %v4098_v46  ;;  %v4139_v46 = vld [vmem:[%s5920_s6 + $0x310] sm:$0xff]  ;;  %v4142_v47 = vld [vmem:[%s5920_s6 + $0x328] sm:$0xff] }
 0x138   : > { %4746 = vset.pattern.permute.xlu1 %v4844_v50 }
 0x139   : > { %4427 = vmatpush1.bf16.msra.mxu1 %v4426_v52  ;;  %1973 = vperm.xlu1 %4746, %v5052_v27   ;;  %v4460_v52 = vpack.c.bf16 %v4106_v49, %v4104_v48  ;;  %v4144_v48 = vld [vmem:[%s5920_s6 + $0x338] sm:$0xff]  ;;  %v980_v49 = vpop.permute.xlu0 %979 }
 0x13a   : > { %4429 = vmatprep.subr.bf16.mxu1 %v4428_v53  ;;  %v4103_v53 = vld [vmem:[%s5920_s6 + $0x200] sm:$0xff] }
 0x13c   : > { %4068 = vmatmul.mubr.msk.f32.vlgmr.msra.gmra.mrb[0].mxu1 %vm535_vm0, %v496_v60  ;;  %v786_v60 = vmul.f32 %v5175_v31, %v784_v58 }
 0x13d   : > { %4431 = vmatpush1.bf16.msra.mxu1 %v4430_v59  ;;  %773 = vmatprep.mubr.f32.mxu1 %v4836_v23  ;;  %v4462_v59 = vpack.c.bf16 %v4105_v54, %v4103_v53  ;;  %v4141_v53 = vld [vmem:[%s5920_s6 + $0x320] sm:$0xff]  ;;  %v4143_v54 = vld [vmem:[%s5920_s6 + $0x330] sm:$0xff] }
 0x13e   : > { %4433 = vmatprep.subr.bf16.mxu1 %v4432_v61  ;;  %4747 = vset.pattern.permute.xlu1 %v4845_v57  ;;  %v4464_v61 = vpack.c.bf16 %v4110_v56, %v4108_v55  ;;  %v4146_v55 = vld [vmem:[%s5920_s6 + $0x348] sm:$0xff]  ;;  %v4148_v56 = vld [vmem:[%s5920_s6 + $0x358] sm:$0xff]  ;;  %v4498_v57 = vpack.c.bf16 %v4143_v54, %v4141_v53 }
 0x13f   : > { %2059 = vperm.xlu1 %4747, %v5052_v27   ;;  %v4500_v58 = vpack.c.bf16 %v4148_v56, %v4146_v55  ;;  %v4186_v53 = vld [vmem:[%s5920_s6 + $0x478] sm:$0xff]  ;;  %v4183_v56 = vld [vmem:[%s5920_s6 + $0x460] sm:$0xff] }
 0x141   : > { %4435 = vmatpush1.bf16.msra.mxu1 %v4434_v2  ;;  %v4466_v2 = vpack.c.bf16 %v4109_v63, %v4107_v62  ;;  %v4152_v62 = vld [vmem:[%s5920_s6 + $0x378] sm:$0xff] }
 0x142   : > { %4437 = vmatprep.subr.bf16.mxu1 %v4436_v3  ;;  %v4468_v3 = vpack.c.bf16 %v4114_v1, %v4112_v0  ;;  %v4149_v1 = vld [vmem:[%s5920_s6 + $0x360] sm:$0xff] }
 0x145   : > { %4439 = vmatpush1.bf16.msra.mxu1 %v4438_v10  ;;  %v4115_v10 = vld [vmem:[%s5920_s6 + $0x260] sm:$0xff] }
 0x146   : > { %4441 = vmatprep.subr.bf16.mxu1 %v4440_v11  ;;  %v4117_v11 = vld [vmem:[%s5920_s6 + $0x270] sm:$0xff] }
 0x147   : > { %v4474_v14 = vpack.c.bf16 %v4117_v11, %v4115_v10  ;;  %v4161_v10 = vld [vmem:[%s5920_s6 + $0x3b8] sm:$0xff]  ;;  %v1078_v11 = vpop.permute.xlu1 %1077 }
 0x148   : > { %v1080_v13 = vmul.f32 %v5175_v31, %v1078_v11  ;;  %v4193_v11 = vld [vmem:[%s5921_s7 + $0x38] sm:$0xff] }
 0x149   : > { %4443 = vmatpush1.bf16.msra.mxu1 %v4442_v18  ;;  %v4125_v18 = vld [vmem:[%s5920_s6 + $0x2a8] sm:$0xff] }
 0x14a   : > { %4445 = vmatprep.subr.bf16.mxu1 %v4444_v19  ;;  %v4127_v19 = vld [vmem:[%s5920_s6 + $0x2b8] sm:$0xff] }
 0x14b   : > { %v4480_v24 = vpack.c.bf16 %v4127_v19, %v4125_v18  ;;  %v4165_v18 = vld [vmem:[%s5920_s6 + $0x3d8] sm:$0xff] }
 0x14c   : > { %4085 = vmatmul.mubr.msk.f32.vlgmr.msra.gmra.mrb[0].mxu1 %vm535_vm0, %v688_v29  ;;  %v4131_v29 = vld [vmem:[%s5920_s6 + $0x2d8] sm:$0xff]  ;;  %v4516_v20 = vpack.c.bf16 %v4165_v18, %v4163_v17  ;;  %v4848_v18 = vmov 19  }
 0x14d   : > { %4447 = vmatpush1.bf16.msra.mxu1 %v4446_v28  ;;  %871 = vmatprep.mubr.f32.mxu1 %v4836_v23  ;;  %v4129_v28 = vld [vmem:[%s5920_s6 + $0x2c8] sm:$0xff] }
 0x14e   : > { %4449 = vmatprep.subr.bf16.mxu1 %v4448_v30  ;;  %v4482_v30 = vpack.c.bf16 %v4126_v26, %v4124_v25  ;;  %v4484_v32 = vpack.c.bf16 %v4131_v29, %v4129_v28  ;;  %v4169_v25 = vld [vmem:[%s5920_s6 + $0x3f8] sm:$0xff]  ;;  %v4166_v29 = vld [vmem:[%s5920_s6 + $0x3e0] sm:$0xff]  ;;  %4749 = vset.pattern.permute.xlu1 %v4848_v18 }
 0x14f   : > { %2323 = vperm.xlu1 %4749, %v5052_v27   ;;  %v4221_v18 = vld [vmem:[%s5921_s7 + $0xe0] sm:$0xff] }
 0x151   : > { %4451 = vmatpush1.bf16.msra.mxu1 %v4450_v37  ;;  %v4486_v37 = vpack.c.bf16 %v4130_v34, %v4128_v33  ;;  %v4174_v33 = vld [vmem:[%s5920_s6 + $0x418] sm:$0xff] }
 0x152   : > { %4453 = vmatprep.subr.bf16.mxu1 %v4452_v38  ;;  %v4488_v38 = vpack.c.bf16 %v4135_v36, %v4133_v35  ;;  %v4171_v36 = vld [vmem:[%s5920_s6 + $0x400] sm:$0xff] }
 0x155   : > { %4455 = vmatpush1.bf16.msra.mxu1 %v4454_v44  ;;  %v4492_v44 = vpack.c.bf16 %v4140_v42, %v4138_v41 }
 0x156   : > { %4457 = vmatprep.subr.bf16.mxu1 %v4456_v45  ;;  %v4137_v45 = vld [vmem:[%s5920_s6 + $0x300] sm:$0xff] }
 0x157   : > { %v4494_v50 = vpack.c.bf16 %v4139_v46, %v4137_v45  ;;  %v4177_v45 = vld [vmem:[%s5920_s6 + $0x430] sm:$0xff]  ;;  %v4180_v46 = vld [vmem:[%s5920_s6 + $0x448] sm:$0xff] }
 0x159   : > { %4459 = vmatpush1.bf16.msra.mxu1 %v4458_v51  ;;  %v982_v51 = vmul.f32 %v5175_v31, %v980_v49 }
 0x15a   : > { %4461 = vmatprep.subr.bf16.mxu1 %v4460_v52  ;;  %v4496_v52 = vpack.c.bf16 %v4144_v48, %v4142_v47  ;;  %v4182_v47 = vld [vmem:[%s5920_s6 + $0x458] sm:$0xff] }
 0x15b   : > { %v4532_v49 = vpack.c.bf16 %v4182_v47, %v4180_v46 }
 0x15c   : > { %4102 = vmatmul.mubr.msk.f32.vlgmr.msra.gmra.mrb[0].mxu1 %vm535_vm0, %v786_v60  ;;  %v4147_v60 = vld [vmem:[%s5920_s6 + $0x350] sm:$0xff] }
 0x15d   : > { %4463 = vmatpush1.bf16.msra.mxu1 %v4462_v59  ;;  %969 = vmatprep.mubr.f32.mxu1 %v4836_v23  ;;  %v4145_v59 = vld [vmem:[%s5920_s6 + $0x340] sm:$0xff] }
 0x15e   : > { %4465 = vmatprep.subr.bf16.mxu1 %v4464_v61  ;;  %v4150_v61 = vld [vmem:[%s5920_s6 + $0x368] sm:$0xff]  ;;  %v4502_v63 = vpack.c.bf16 %v4147_v60, %v4145_v59  ;;  %v1379_v59 = vld [vmem:[%s5917_s3] sm:$0xff] }
 0x15f   : > { %v4504_v0 = vpack.c.bf16 %v4152_v62, %v4150_v61  ;;  %v1380_v60 = vld [vmem:[%s5917_s3 + $0x8] sm:$0xff]  ;;  %v1274_v61 = vpop.permute.xlu0 %1273 }
 0x160   : > { %v4541_v62 = vpack.c.bf16 %v1380_v60, %v1379_v59  ;;  %v4208_v59 = vld [vmem:[%s5921_s7 + $0x90] sm:$0xff]  ;;  %v4212_v60 = vld [vmem:[%s5921_s7 + $0xa8] sm:$0xff] }
 0x161   : > { %4467 = vmatpush1.bf16.msra.mxu1 %v4466_v2  ;;  %v4151_v2 = vld [vmem:[%s5920_s6 + $0x370] sm:$0xff] }
 0x162   : > { %4469 = vmatprep.subr.bf16.mxu1 %v4468_v3  ;;  %v4155_v3 = vld [vmem:[%s5920_s6 + $0x388] sm:$0xff]  ;;  %v4506_v5 = vpack.c.bf16 %v4151_v2, %v4149_v1  ;;  %v1381_v1 = vld [vmem:[%s5917_s3 + $0x10] sm:$0xff]  ;;  %v1382_v2 = vld [vmem:[%s5917_s3 + $0x18] sm:$0xff] }
 0x163   : > { %v4508_v6 = vpack.c.bf16 %v4157_v4, %v4155_v3  ;;  %v4544_v3 = vpack.c.bf16 %v1382_v2, %v1381_v1  ;;  %v1383_v4 = vld [vmem:[%s5917_s3 + $0x20] sm:$0xff] }
 0x165   : > { %4471 = vmatpush1.bf16.msra.mxu1 %v4470_v8  ;;  %v4156_v8 = vld [vmem:[%s5920_s6 + $0x390] sm:$0xff] }
 0x166   : > { %4473 = vmatprep.subr.bf16.mxu1 %v4472_v9  ;;  %v4159_v9 = vld [vmem:[%s5920_s6 + $0x3a8] sm:$0xff]  ;;  %v4510_v12 = vpack.c.bf16 %v4156_v8, %v4154_v7  ;;  %v1385_v7 = vld [vmem:[%s5917_s3 + $0x30] sm:$0xff]  ;;  %v1386_v8 = vld [vmem:[%s5917_s3 + $0x38] sm:$0xff] }
 0x169   : > { %4475 = vmatpush1.bf16.msra.mxu1 %v4474_v14  ;;  %v4512_v14 = vpack.c.bf16 %v4161_v10, %v4159_v9  ;;  %v4550_v9 = vpack.c.bf16 %v1386_v8, %v1385_v7  ;;  %v4191_v10 = vld [vmem:[%s5921_s7 + $0x28] sm:$0xff] }
 0x16a   : > { %4477 = vmatprep.subr.bf16.mxu1 %v4476_v15  ;;  %v4158_v15 = vld [vmem:[%s5920_s6 + $0x3a0] sm:$0xff] }
 0x16b   : > { %v4514_v19 = vpack.c.bf16 %v4160_v16, %v4158_v15  ;;  %v1468_v16 = vld [vmem:[%s5921_s7 + $0x18] sm:$0xff] }
 0x16c   : > { %4119 = vmatmul.mubr.msk.f32.vlgmr.msra.gmra.mrb[0].mxu1 %vm535_vm0, %v884_v22  ;;  %v4164_v22 = vld [vmem:[%s5920_s6 + $0x3d0] sm:$0xff] }
 0x16d   : > { %4479 = vmatpush1.bf16.msra.mxu1 %v4478_v21  ;;  %1067 = vmatprep.mubr.f32.mxu1 %v4836_v23  ;;  %v4162_v21 = vld [vmem:[%s5920_s6 + $0x3c0] sm:$0xff] }
 0x16e   : > { %4481 = vmatprep.subr.bf16.mxu1 %v4480_v24  ;;  %v4167_v24 = vld [vmem:[%s5920_s6 + $0x3e8] sm:$0xff]  ;;  %v4518_v26 = vpack.c.bf16 %v4164_v22, %v4162_v21  ;;  %v4851_v21 = vmov 23   ;;  %v4852_v22 = vmov 21  }
 0x16f   : > { %v4520_v28 = vpack.c.bf16 %v4169_v25, %v4167_v24  ;;  %v4853_v24 = vmov 26   ;;  %v4854_v25 = vmov 22  }
 0x171   : > { %4483 = vmatpush1.bf16.msra.mxu1 %v4482_v30  ;;  %v4168_v30 = vld [vmem:[%s5920_s6 + $0x3f0] sm:$0xff] }
 0x172   : > { %4485 = vmatprep.subr.bf16.mxu1 %v4484_v32  ;;  %v4172_v32 = vld [vmem:[%s5920_s6 + $0x408] sm:$0xff]  ;;  %v4522_v34 = vpack.c.bf16 %v4168_v30, %v4166_v29 }
 0x173   : > { %v4524_v35 = vpack.c.bf16 %v4174_v33, %v4172_v32  ;;  %v1465_v33 = vld [vmem:[%s5921_s7] sm:$0xff] }
 0x175   : > { %4487 = vmatpush1.bf16.msra.mxu1 %v4486_v37  ;;  %v4173_v37 = vld [vmem:[%s5920_s6 + $0x410] sm:$0xff] }
 0x176   : > { %4489 = vmatprep.subr.bf16.mxu1 %v4488_v38  ;;  %v1176_v38 = vpop.permute.xlu1 %1175  ;;  %v4526_v41 = vpack.c.bf16 %v4173_v37, %v4171_v36 }
 0x177   : > { %v1178_v42 = vmul.f32 %v5175_v31, %v1176_v38 }
 0x179   : > { %4491 = vmatpush1.bf16.msra.mxu1 %v4490_v43  ;;  %v4528_v43 = vpack.c.bf16 %v4178_v40, %v4176_v39 }
 0x17a   : > { %4493 = vmatprep.subr.bf16.mxu1 %v4492_v44  ;;  %v4175_v44 = vld [vmem:[%s5920_s6 + $0x420] sm:$0xff]  ;;  %v1471_v36 = vpop.permute.xlu1 %1470 }
 0x17b   : > { %v4530_v48 = vpack.c.bf16 %v4177_v45, %v4175_v44  ;;  %v4202_v44 = vld [vmem:[%s5921_s7 + $0x68] sm:$0xff]  ;;  %v4204_v45 = vld [vmem:[%s5921_s7 + $0x78] sm:$0xff] }
 0x17c   : > { %4136 = vmatmul.mubr.msk.f32.vlgmr.msra.gmra.mrb[0].mxu1 %vm535_vm0, %v982_v51  ;;  %v4181_v51 = vld [vmem:[%s5920_s6 + $0x450] sm:$0xff] }
 0x17d   : > { %4495 = vmatpush1.bf16.msra.mxu1 %v4494_v50  ;;  %1165 = vmatprep.mubr.f32.mxu1 %v4836_v23  ;;  %v4179_v50 = vld [vmem:[%s5920_s6 + $0x440] sm:$0xff] }
 0x17e   : > { %4497 = vmatprep.subr.bf16.mxu1 %v4496_v52  ;;  %v4184_v52 = vld [vmem:[%s5920_s6 + $0x468] sm:$0xff]  ;;  %v4534_v54 = vpack.c.bf16 %v4181_v51, %v4179_v50  ;;  %v1462_v46 = vpop.permute.xlu1 %1461  ;;  %v4201_v50 = vld [vmem:[%s5921_s7 + $0x60] sm:$0xff]  ;;  %v4203_v51 = vld [vmem:[%s5921_s7 + $0x70] sm:$0xff] }
 0x17f   : > { %v4536_v55 = vpack.c.bf16 %v4186_v53, %v4184_v52  ;;  %v4207_v52 = vld [vmem:[%s5921_s7 + $0x88] sm:$0xff]  ;;  %v4209_v53 = vld [vmem:[%s5921_s7 + $0x98] sm:$0xff] }
 0x181   : > { %4499 = vmatpush1.bf16.msra.mxu1 %v4498_v57  ;;  %v4185_v57 = vld [vmem:[%s5920_s6 + $0x470] sm:$0xff] }
 0x182   : > { %4501 = vmatprep.subr.bf16.mxu1 %v4500_v58  ;;  %v4538_v58 = vpack.c.bf16 %v4185_v57, %v4183_v56  ;;  %v4568_v57 = vpack.c.bf16 %v4209_v53, %v4207_v52 }
 0x185   : > { %4503 = vmatpush1.bf16.msra.mxu1 %v4502_v63  ;;  %v1276_v63 = vmul.f32 %v5175_v31, %v1274_v61  ;;  %v4214_v61 = vld [vmem:[%s5921_s7 + $0xb8] sm:$0xff] }
 0x186   : > { %4505 = vmatprep.subr.bf16.mxu1 %v4504_v0  ;;  %v4846_v0 = vmov 0.0|0.0   ;;  %v4572_v2 = vpack.c.bf16 %v4214_v61, %v4212_v60  ;;  %v2485_v61 = vld [vmem:[#allocation2 + $0x20] sm:$0xff] }
 0x189   : > { %4507 = vmatpush1.bf16.msra.mxu1 %v4506_v5  ;;  %v1384_v5 = vld [vmem:[%s5917_s3 + $0x28] sm:$0xff] }
 0x18a   : > { %4509 = vmatprep.subr.bf16.mxu1 %v4508_v6  ;;  %v4547_v6 = vpack.c.bf16 %v1384_v5, %v1383_v4  ;;  %v4213_v4 = vld [vmem:[%s5921_s7 + $0xb0] sm:$0xff]  ;;  %v4217_v5 = vld [vmem:[%s5921_s7 + $0xc8] sm:$0xff] }
 0x18c   : > { %4153 = vmatmul.mubr.msk.f32.vlgmr.msra.gmra.mrb[0].mxu1 %vm535_vm0, %v1080_v13  ;;  %v4552_v13 = vpack.c.bf16 %v4193_v11, %v4191_v10  ;;  %v4216_v11 = vld [vmem:[%s5921_s7 + $0xc0] sm:$0xff] }
 0x18d   : > { %4511 = vmatpush1.bf16.msra.mxu1 %v4510_v12  ;;  %1263 = vmatprep.mubr.f32.mxu1 %v4836_v23  ;;  %v4190_v12 = vld [vmem:[%s5921_s7 + $0x20] sm:$0xff] }
 0x18e   : > { %4513 = vmatprep.subr.bf16.mxu1 %v4512_v14  ;;  %v4192_v14 = vld [vmem:[%s5921_s7 + $0x30] sm:$0xff]  ;;  %4553 = vmatprep.subr.bf16.mxu0 %v4552_v13  ;;  %v4222_v13 = vld [vmem:[%s5921_s7 + $0xe8] sm:$0xff] }
 0x18f   : > { %v4554_v15 = vpack.c.bf16 %v4192_v14, %v4190_v12  ;;  %v4218_v12 = vld [vmem:[%s5921_s7 + $0xd0] sm:$0xff]  ;;  %v4224_v14 = vld [vmem:[%s5921_s7 + $0xf8] sm:$0xff] }
 0x191   : > { %4515 = vmatpush1.bf16.msra.mxu1 %v4514_v19  ;;  %4555 = vmatpush1.bf16.msra.mxu0 %v4554_v15  ;;  %v4849_v19 = vmov 20  }
 0x192   : > { %4517 = vmatprep.subr.bf16.mxu1 %v4516_v20  ;;  %4751 = vset.pattern.permute.xlu0 %v4849_v19  ;;  %v4850_v20 = vmov 18   ;;  %v4223_v19 = vld [vmem:[%s5921_s7 + $0xf0] sm:$0xff] }
 0x193   : > { %2480 = vperm.xlu0 %4751, %v5052_v27   ;;  %4750 = vset.pattern.permute.xlu1 %v4850_v20  ;;  %v4227_v20 = vld [vmem:[%s5921_s7 + $0x108] sm:$0xff] }
 0x194   : > { %2316 = vperm.xlu1 %4750, %v5052_v27  }
 0x195   : > { %4519 = vmatpush1.bf16.msra.mxu1 %v4518_v26  ;;  %v4855_v26 = vmov 24  }
 0x196   : > { %4521 = vmatprep.subr.bf16.mxu1 %v4520_v28  ;;  %v4856_v28 = vmov 25  }
 0x197   : > { %4754 = vset.pattern.permute.xlu0 %v4851_v21  ;;  %v4229_v21 = vld [vmem:[%s5921_s7 + $0x118] sm:$0xff] }
 0x198   : > { %2732 = vperm.xlu0 %4754, %v5052_v27   ;;  %4752 = vset.pattern.permute.xlu1 %v4852_v22 }
 0x199   : > { %4523 = vmatpush1.bf16.msra.mxu1 %v4522_v34  ;;  %2564 = vperm.xlu1 %4752, %v5052_v27   ;;  %v1467_v34 = vld [vmem:[%s5921_s7 + $0x10] sm:$0xff] }
 0x19a   : > { %4525 = vmatprep.subr.bf16.mxu1 %v4524_v35  ;;  %v4199_v35 = vld [vmem:[%s5921_s7 + $0x58] sm:$0xff]  ;;  %v4558_v38 = vpack.c.bf16 %v1467_v34, %v1465_v33  ;;  %v2240_v34 = vld [vmem:[%s5918_s4] sm:$0xff] }
 0x19c   : > { %4170 = vmatmul.mubr.msk.f32.vlgmr.msra.gmra.mrb[0].mxu1 %vm535_vm0, %v1178_v42  ;;  %4757 = vset.pattern.permute.xlu0 %v4853_v24  ;;  %v4196_v42 = vld [vmem:[%s5921_s7 + $0x40] sm:$0xff]  ;;  %v4582_v24 = vpack.c.bf16 %v4223_v19, %v4221_v18  ;;  %v2990_v18 = vld [vmem:[#allocation2 + $0x88] sm:$0xff] }
 0x19d   : > { %4527 = vmatpush1.bf16.msra.mxu1 %v4526_v41  ;;  %1361 = vmatprep.mubr.f32.mxu1 %v4836_v23 }
 0x19e   : > { %4529 = vmatprep.subr.bf16.mxu1 %v4528_v43  ;;  %2984 = vperm.xlu0 %4757, %v5052_v27   ;;  %v4198_v43 = vld [vmem:[%s5921_s7 + $0x50] sm:$0xff] }
 0x19f   : > { %4753 = vset.pattern.permute.xlu1 %v4854_v25  ;;  %v4562_v47 = vpack.c.bf16 %v4198_v43, %v4196_v42  ;;  %v4767_v42 = vld [vmem:[%s5032_s30] sm:$0xff]  ;;  %v4858_v43 = vmov 29  }
 0x1a0   : > { %2648 = vperm.xlu1 %4753, %v5052_v27  }
 0x1a1   : > { %4531 = vmatpush1.bf16.msra.mxu1 %v4530_v48 }
 0x1a2   : > { %4533 = vmatprep.subr.bf16.mxu1 %v4532_v49  ;;  %v4564_v49 = vpack.c.bf16 %v4204_v45, %v4202_v44  ;;  %4760 = vset.pattern.permute.xlu0 %v4858_v43  ;;  %v4859_v44 = vmov 27   ;;  %v4860_v45 = vmov 32  }
 0x1a3   : > { %3315 = vperm.xlu0 %4760, %v4767_v42  }
 0x1a4   : > { %4755 = vset.pattern.permute.xlu1 %v4855_v26  ;;  %v4584_v26 = vpack.c.bf16 %v4229_v21, %v4227_v20  ;;  %v2989_v21 = vld [vmem:[#allocation2 + $0x80] sm:$0xff] }
 0x1a5   : > { %4535 = vmatpush1.bf16.msra.mxu1 %v4534_v54  ;;  %2816 = vperm.xlu1 %4755, %v5052_v27   ;;  %v1630_v54 = vpop.permute.xlu0 %1629 }
 0x1a6   : > { %4537 = vmatprep.subr.bf16.mxu1 %v4536_v55  ;;  %v4566_v55 = vpack.c.bf16 %v4203_v51, %v4201_v50 }
 0x1a7   : > { %4763 = vset.pattern.permute.xlu0 %v4860_v45  ;;  %v4253_v45 = vld [vmem:[%s5923_s9 + $0x30] sm:$0xff] }
 0x1a8   : > { %3567 = vperm.xlu0 %4763, %v4767_v42  }
 0x1a9   : > { %4539 = vmatpush1.bf16.msra.mxu1 %v4538_v58  ;;  %4756 = vset.pattern.permute.xlu1 %v4856_v28  ;;  %v4206_v58 = vld [vmem:[%s5921_s7 + $0x80] sm:$0xff]  ;;  %v1888_v15 = vpop.permute.xlu0 %1887 }
 0x1aa   : > { %4540 = vmatprep.subr.bf16.mxu1 %v4846_v0  ;;  %2900 = vperm.xlu1 %4756, %v5052_v27   ;;  %v4197_v27 = vld [vmem:[%s5921_s7 + $0x48] sm:$0xff]  ;;  %v4226_v28 = vld [vmem:[%s5921_s7 + $0x100] sm:$0xff] }
 0x1ab   : > { %v4560_v41 = vpack.c.bf16 %v4199_v35, %v4197_v27  ;;  %v2241_v27 = vld [vmem:[%s5918_s4 + $0x8] sm:$0xff] }
 0x1ac   : > { %4187 = vmatmul.mubr.msk.f32.vlgmr.msra.gmra.mrb[0].mxu1 %vm535_vm0, %v1276_v63  ;;  %v4570_v63 = vpack.c.bf16 %v4208_v59, %v4206_v58  ;;  %v2486_v58 = vld [vmem:[#allocation2 + $0x28] sm:$0xff] }
 0x1ad   : > { %4542 = vmatpush3.bf16.msra.mxu1 %v4541_v62  ;;  %4349 = vmatprep.mubr.msk.f32.mxu1 %vm4847_vm1, %v4836_v23  ;;  %v1716_v62 = vpop.permute.xlu1 %1715 }
 0x1ae   : > { %4543 = vmatprep.subr.bf16.mxu1 %v4846_v0  ;;  %v2146_v35 = vpop.permute.xlu0 %2145 }
 0x1b1   : > { %4545 = vmatpush3.bf16.msra.mxu1 %v4544_v3  ;;  %v4211_v3 = vld [vmem:[%s5921_s7 + $0xa0] sm:$0xff] }
 0x1b2   : > { %4546 = vmatprep.subr.bf16.mxu1 %v4846_v0  ;;  %v4574_v8 = vpack.c.bf16 %v4213_v4, %v4211_v3  ;;  %v2654_v3 = vld [vmem:[#allocation2 + $0x48] sm:$0xff] }
 0x1b3   : > { %v1802_v7 = vpop.permute.xlu1 %1801 }
 0x1b5   : > { %4548 = vmatpush3.bf16.msra.mxu1 %v4547_v6  ;;  %v4219_v6 = vld [vmem:[%s5921_s7 + $0xd8] sm:$0xff] }
 0x1b6   : > { %4549 = vmatprep.subr.bf16.mxu1 %v4846_v0  ;;  %v4576_v10 = vpack.c.bf16 %v4219_v6, %v4217_v5  ;;  %v2653_v6 = vld [vmem:[#allocation2 + $0x40] sm:$0xff] }
 0x1b8   : > { %v1974_v22 = vpop.permute.xlu1 %1973 }
 0x1b9   : > { %4551 = vmatpush3.bf16.msra.mxu1 %v4550_v9 }
 0x1bc   : > { %4350 = vmatmul.mubr.msk.f32.vlgmr.msra.gmra.mrb[2].mxu1 %vm535_vm0, %v5175_v31  ;;  %v1466_v31 = vld [vmem:[%s5921_s7 + $0x8] sm:$0xff] }
 0x1bd   : > { %v4556_v17 = vpack.c.bf16 %v1468_v16, %v1466_v31  ;;  %v4578_v31 = vpack.c.bf16 %v4218_v12, %v4216_v11  ;;  %v2822_v11 = vld [vmem:[#allocation2 + $0x68] sm:$0xff] }
 0x1bf   : > { %4557 = vmatprep.subr.bf16.mxu0 %v4556_v17  ;;  %v4580_v17 = vpack.c.bf16 %v4224_v14, %v4222_v13  ;;  %v2821_v14 = vld [vmem:[#allocation2 + $0x60] sm:$0xff] }
 0x27f   : > { %v1363_v29 = vpop.f32.mrb[0].mxu1 }
 0x280   : > { %v1365_v30 = vpop.f32.mrb[1].mxu1 }
 0x281   : > { %v4279_v32 = vpack.c.bf16 %v1365_v30, %v1363_v29  ;;  %v4228_v29 = vld [vmem:[%s5921_s7 + $0x110] sm:$0xff]  ;;  %v2060_v30 = vpop.permute.xlu1 %2059 }
 0x283   : > { %1378 = vst [vmem:[%s5638_s23] sm:$0xff] %v4279_v32  ;;  %v4586_v32 = vpack.c.bf16 %v4228_v29, %v4226_v28  ;;  %v4246_v28 = vld [vmem:[%s5923_s9 + $0x10] sm:$0xff]  ;;  %v3157_v29 = vld [vmem:[%s5923_s9 + $0x8] sm:$0xff] }
 0x285   : > { %v2324_v53 = vpop.permute.xlu1 %2323 }
 0x289   : > { %v2317_v59 = vpop.permute.xlu1 %2316 }
 0x28d   : > { %v2565_v4 = vpop.permute.xlu1 %2564 }
 0x28f   : > { %v5653_v37 = vpop.f32.mrb[2].mxu1 }
 0x290   : > { %v4351_v39 = vpop.f32.mrb[3].mxu1  ;;  %v1473_v40 = vmul.f32 %v1471_v36, %v5653_v37  ;;  %v1464_v48 = vmul.f32 %v1462_v46, %v5653_v37  ;;  %v1632_v56 = vmul.f32 %v1630_v54, %v5653_v37  ;;  %v1718_v1 = vmul.f32 %v1716_v62, %v5653_v37  ;;  %v2570_v62 = vld [vmem:[#allocation2 + $0x38] sm:$0xff] }
 0x291   : > { %v1804_v9 = vmul.f32 %v1802_v7, %v5653_v37  ;;  %v1890_v16 = vmul.f32 %v1888_v15, %v5653_v37  ;;  %v1976_v25 = vmul.f32 %v1974_v22, %v5653_v37  ;;  %v2062_v33 = vmul.f32 %v2060_v30, %v5653_v37  ;;  %v2328_v39 = vld [vmem:[#allocation2 + $0x10] sm:$0xff]  ;;  %v2738_v7 = vld [vmem:[#allocation2 + $0x58] sm:$0xff] }
 0x292   : > { %4194 = vmatmul.mubr.msk.f32.vlgmr.msra.gmra.mrb[2].mxu0 %vm1479_vm2, %v1473_v40  ;;  %v4589_v36 = vpack.c.bf16 %v2241_v27, %v2240_v34  ;;  %v2321_v40 = vld [vmem:[#allocation2 + $0x8] sm:$0xff]  ;;  %v4862_v46 = vmov 35   ;;  %v2906_v15 = vld [vmem:[#allocation2 + $0x78] sm:$0xff] }
 0x293   : > { %4559 = vmatpush1.bf16.msra.mxu0 %v4558_v38  ;;  %1621 = vmatprep.mubr.f32.mxu0 %v4836_v23  ;;  %v2148_v38 = vmul.f32 %v2146_v35, %v5653_v37 }
 0x294   : > { %4561 = vmatprep.subr.bf16.mxu0 %v4560_v41  ;;  %v4857_v41 = vmov 28   ;;  %4766 = vset.pattern.permute.xlu0 %v4862_v46 }
 0x295   : > { %4758 = vset.pattern.permute.xlu1 %v4857_v41  ;;  %3819 = vperm.xlu0 %4766, %v4767_v42   ;;  %v4250_v41 = vld [vmem:[%s5923_s9 + $0x20] sm:$0xff] }
 0x296   : > { %3159 = vperm.xlu1 %4758, %v4767_v42  }
 0x29a   : > { %4195 = vmatmul.mubr.msk.f32.vlgmr.msra.gmra.mrb[2].mxu0 %vm1479_vm2, %v1464_v48  ;;  %4759 = vset.pattern.permute.xlu1 %v4859_v44  ;;  %v4864_v48 = vmov 33  }
 0x29b   : > { %4563 = vmatpush1.bf16.msra.mxu0 %v4562_v47  ;;  %1705 = vmatprep.mubr.f32.mxu0 %v4836_v23  ;;  %v4863_v47 = vmov 31  }
 0x29c   : > { %4565 = vmatprep.subr.bf16.mxu0 %v4564_v49  ;;  %3152 = vperm.xlu1 %4759, %v4767_v42   ;;  %v4865_v49 = vmov 34  }
 0x2a2   : > { %4200 = vmatmul.mubr.msk.f32.vlgmr.msra.gmra.mrb[2].mxu0 %vm1479_vm2, %v1632_v56 }
 0x2a3   : > { %4567 = vmatpush1.bf16.msra.mxu0 %v4566_v55  ;;  %1791 = vmatprep.mubr.f32.mxu0 %v4836_v23 }
 0x2a4   : > { %4569 = vmatprep.subr.bf16.mxu0 %v4568_v57  ;;  %v2320_v57 = vld [vmem:[#allocation2] sm:$0xff] }
 0x2aa   : > { %4205 = vmatmul.mubr.msk.f32.vlgmr.msra.gmra.mrb[2].mxu0 %vm1479_vm2, %v1718_v1 }
 0x2ab   : > { %4571 = vmatpush1.bf16.msra.mxu0 %v4570_v63  ;;  %1877 = vmatprep.mubr.f32.mxu0 %v4836_v23  ;;  %v2481_v63 = vpop.permute.xlu0 %2480 }
 0x2ac   : > { %4573 = vmatprep.subr.bf16.mxu0 %v4572_v2  ;;  %v2569_v2 = vld [vmem:[#allocation2 + $0x30] sm:$0xff] }
 0x2af   : > { %v2733_v12 = vpop.permute.xlu0 %2732 }
 0x2b2   : > { %4210 = vmatmul.mubr.msk.f32.vlgmr.msra.gmra.mrb[2].mxu0 %vm1479_vm2, %v1804_v9 }
 0x2b3   : > { %4575 = vmatpush1.bf16.msra.mxu0 %v4574_v8  ;;  %1963 = vmatprep.mubr.f32.mxu0 %v4836_v23  ;;  %v2649_v8 = vpop.permute.xlu1 %2648  ;;  %v2985_v22 = vpop.permute.xlu0 %2984 }
 0x2b4   : > { %4577 = vmatprep.subr.bf16.mxu0 %v4576_v10  ;;  %v2737_v10 = vld [vmem:[#allocation2 + $0x50] sm:$0xff] }
 0x2b7   : > { %v3316_v43 = vpop.permute.xlu0 %3315 }
 0x2ba   : > { %4215 = vmatmul.mubr.msk.f32.vlgmr.msra.gmra.mrb[2].mxu0 %vm1479_vm2, %v1890_v16 }
 0x2bb   : > { %4579 = vmatpush1.bf16.msra.mxu0 %v4578_v31  ;;  %2049 = vmatprep.mubr.f32.mxu0 %v4836_v23  ;;  %v2817_v31 = vpop.permute.xlu1 %2816 }
 0x2bc   : > { %4581 = vmatprep.subr.bf16.mxu0 %v4580_v17  ;;  %v2905_v17 = vld [vmem:[#allocation2 + $0x70] sm:$0xff] }
 0x2bf   : > { %v2901_v19 = vpop.permute.xlu1 %2900 }
 0x2c2   : > { %4220 = vmatmul.mubr.msk.f32.vlgmr.msra.gmra.mrb[2].mxu0 %vm1479_vm2, %v1976_v25  ;;  %v3077_v25 = vld [vmem:[%s5919_s5] sm:$0xff] }
 0x2c3   : > { %4583 = vmatpush1.bf16.msra.mxu0 %v4582_v24  ;;  %2135 = vmatprep.mubr.f32.mxu0 %v4836_v23 }
 0x2c4   : > { %4585 = vmatprep.subr.bf16.mxu0 %v4584_v26  ;;  %v4247_v26 = vld [vmem:[%s5923_s9 + $0x18] sm:$0xff] }
 0x2ca   : > { %4225 = vmatmul.mubr.msk.f32.vlgmr.msra.gmra.mrb[2].mxu0 %vm1479_vm2, %v2062_v33 }
 0x2cb   : > { %4587 = vmatpush1.bf16.msra.mxu0 %v4586_v32  ;;  %2221 = vmatprep.mubr.f32.mxu0 %v4836_v23 }
 0x2cc   : > { %4588 = vmatprep.subr.bf16.mxu0 %v4846_v0  ;;  %v2329_v0 = vld [vmem:[#allocation2 + $0x18] sm:$0xff] }
 0x2d2   : > { %4230 = vmatmul.mubr.msk.f32.vlgmr.msra.gmra.mrb[2].mxu0 %vm1479_vm2, %v2148_v38  ;;  %v3156_v38 = vld [vmem:[%s5923_s9] sm:$0xff] }
 0x2d3   : > { %4590 = vmatpush3.bf16.msra.mxu0 %v4589_v36  ;;  %4356 = vmatprep.mubr.msk.f32.mxu0 %vm4847_vm1, %v4836_v23 }
 0x2d4   : > { %2334 = vmatprep.subr.mxu0 %v2329_v0  ;;  %v4251_v0 = vld [vmem:[%s5923_s9 + $0x28] sm:$0xff] }
 0x2d6   : > { %4357 = vmatmul.mubr.msk.f32.vlgmr.msra.gmra.mrb[4].mxu0 %vm1479_vm2, %v5653_v37  ;;  %v4861_v37 = vmov 30  }
 0x2d7   : > { %2398 = vmatprep.mubr.f32.mxu0 %v4836_v23  ;;  %2335 = vmatpush1.msra.mxu0 %v2328_v39 }
 0x2d8   : > { %2408 = vmatprep.subr.mxu0 %v2321_v40  ;;  %4761 = vset.pattern.permute.xlu1 %v4861_v37  ;;  %v4257_v37 = vld [vmem:[%s5923_s9 + $0x48] sm:$0xff] }
 0x2d9   : > { %3399 = vperm.xlu1 %4761, %v4767_v42  }
 0x2dd   : > { %4762 = vset.pattern.permute.xlu1 %v4863_v47 }
 0x2de   : > { %3483 = vperm.xlu1 %4762, %v4767_v42  }
 0x2e2   : > { %4764 = vset.pattern.permute.xlu1 %v4864_v48  ;;  %v4256_v48 = vld [vmem:[%s5923_s9 + $0x40] sm:$0xff] }
 0x2e3   : > { %3651 = vperm.xlu1 %4764, %v4767_v42  }
 0x2e7   : > { %4765 = vset.pattern.permute.xlu1 %v4865_v49  ;;  %v4260_v49 = vld [vmem:[%s5923_s9 + $0x58] sm:$0xff] }
 0x2e8   : > { %3735 = vperm.xlu1 %4765, %v4767_v42   ;;  %v4254_v42 = vld [vmem:[%s5923_s9 + $0x38] sm:$0xff] }
 0x315   : > { %v3160_v34 = vpop.permute.xlu1 %3159 }
 0x31b   : > { %v3153_v39 = vpop.permute.xlu1 %3152 }
 0x358   : > { %v3400_v46 = vpop.permute.xlu1 %3399 }
 0x3a5   : > { %v2223_v50 = vpop.f32.mrb[2].mxu0 }
 0x3a6   : > { %v2225_v51 = vpop.f32.mrb[3].mxu0 }
 0x3a7   : > { %v4280_v52 = vpack.c.bf16 %v2225_v51, %v2223_v50  ;;  %v3484_v50 = vpop.permute.xlu1 %3483 }
 0x3a9   : > { %4232 = vst [vmem:[%s5638_s23 + $0x8] sm:$0xff] %v4280_v52  ;;  %v5773_v54 = vpop.f32.mrb[4].mxu0  ;;  %v4259_v52 = vld [vmem:[%s5923_s9 + $0x50] sm:$0xff] }
 0x3aa   : > { %v4358_v55 = vpop.f32.mrb[5].mxu0  ;;  %v2326_v56 = vmul.f32 %v2324_v53, %v5773_v54  ;;  %v2319_v60 = vmul.f32 %v2317_v59, %v5773_v54  ;;  %v2483_v1 = vmul.f32 %v2481_v63, %v5773_v54  ;;  %v2567_v5 = vmul.f32 %v2565_v4, %v5773_v54  ;;  %v4263_v53 = vld [vmem:[%s5923_s9 + $0x68] sm:$0xff] }
 0x3ab   : > { %v2651_v9 = vmul.f32 %v2649_v8, %v5773_v54  ;;  %v2735_v13 = vmul.f32 %v2733_v12, %v5773_v54  ;;  %v2819_v16 = vmul.f32 %v2817_v31, %v5773_v54  ;;  %v2903_v20 = vmul.f32 %v2901_v19, %v5773_v54 }
 0x3ac   : > { %4234 = vmatmul.mubr.msk.f32.vlgmr.msra.gmra.mrb[6].mxu0 %vm2330_vm3, %v2326_v56  ;;  %v2987_v24 = vmul.f32 %v2985_v22, %v5773_v54  ;;  %v4262_v56 = vld [vmem:[%s5923_s9 + $0x60] sm:$0xff] }
 0x3ad   : > { %2409 = vmatpush1.msra.mxu0 %v2320_v57  ;;  %2472 = vmatprep.mubr.f32.mxu0 %v4836_v23  ;;  %v4266_v57 = vld [vmem:[%s5923_s9 + $0x78] sm:$0xff] }
 0x3ae   : > { %2490 = vmatprep.subr.mxu0 %v2486_v58  ;;  %v3652_v58 = vpop.permute.xlu1 %3651 }
 0x3b4   : > { %4235 = vmatmul.mubr.msk.f32.vlgmr.msra.gmra.mrb[6].mxu0 %vm2330_vm3, %v2319_v60  ;;  %v4265_v60 = vld [vmem:[%s5923_s9 + $0x70] sm:$0xff] }
 0x3b5   : > { %2491 = vmatpush1.msra.mxu0 %v2485_v61  ;;  %2554 = vmatprep.mubr.f32.mxu0 %v4836_v23  ;;  %v4269_v61 = vld [vmem:[%s5923_s9 + $0x88] sm:$0xff] }
 0x3b6   : > { %2574 = vmatprep.subr.mxu0 %v2570_v62  ;;  %v3736_v62 = vpop.permute.xlu1 %3735 }
 0x3bc   : > { %4236 = vmatmul.mubr.msk.f32.vlgmr.msra.gmra.mrb[6].mxu0 %vm2330_vm3, %v2483_v1  ;;  %v4268_v1 = vld [vmem:[%s5923_s9 + $0x80] sm:$0xff] }
 0x3bd   : > { %2575 = vmatpush1.msra.mxu0 %v2569_v2  ;;  %2638 = vmatprep.mubr.f32.mxu0 %v4836_v23 }
 0x3be   : > { %2658 = vmatprep.subr.mxu0 %v2654_v3 }
 0x3c4   : > { %4237 = vmatmul.mubr.msk.f32.vlgmr.msra.gmra.mrb[6].mxu0 %vm2330_vm3, %v2567_v5 }
 0x3c5   : > { %2659 = vmatpush1.msra.mxu0 %v2653_v6  ;;  %2722 = vmatprep.mubr.f32.mxu0 %v4836_v23 }
 0x3c6   : > { %2742 = vmatprep.subr.mxu0 %v2738_v7  ;;  %v3955_v7 = vld [vmem:[%s5638_s23] sm:$0xff] (%p5933_p6) }
 0x3c7   : > { %3956 = vst [vmem:[%s3921_s22] sm:$0xff] (%p5933_p6), %v3955_v7 }
 0x3cc   : > { %4238 = vmatmul.mubr.msk.f32.vlgmr.msra.gmra.mrb[6].mxu0 %vm2330_vm3, %v2651_v9 }
 0x3cd   : > { %2743 = vmatpush1.msra.mxu0 %v2737_v10  ;;  %2806 = vmatprep.mubr.f32.mxu0 %v4836_v23 }
 0x3ce   : > { %2826 = vmatprep.subr.mxu0 %v2822_v11 }
 0x3d4   : > { %4239 = vmatmul.mubr.msk.f32.vlgmr.msra.gmra.mrb[6].mxu0 %vm2330_vm3, %v2735_v13 }
 0x3d5   : > { %2827 = vmatpush1.msra.mxu0 %v2821_v14  ;;  %2890 = vmatprep.mubr.f32.mxu0 %v4836_v23 }
 0x3d6   : > { %2910 = vmatprep.subr.mxu0 %v2906_v15 }
 0x3dc   : > { %4240 = vmatmul.mubr.msk.f32.vlgmr.msra.gmra.mrb[6].mxu0 %vm2330_vm3, %v2819_v16 }
 0x3dd   : > { %2911 = vmatpush1.msra.mxu0 %v2905_v17  ;;  %2974 = vmatprep.mubr.f32.mxu0 %v4836_v23 }
 0x3de   : > { %2994 = vmatprep.subr.mxu0 %v2990_v18 }
 0x3e4   : > { %4241 = vmatmul.mubr.msk.f32.vlgmr.msra.gmra.mrb[6].mxu0 %vm2330_vm3, %v2903_v20 }
 0x3e5   : > { %2995 = vmatpush1.msra.mxu0 %v2989_v21  ;;  %3058 = vmatprep.mubr.f32.mxu0 %v4836_v23 }
 0x3e6   : > { %4359 = vmatprep.subr.mxu0 %v4836_v23 }
 0x3ec   : > { %4242 = vmatmul.mubr.msk.f32.vlgmr.msra.gmra.mrb[6].mxu0 %vm2330_vm3, %v2987_v24 }
 0x3ed   : > { %4360 = vmatpush3.msra.mxu0 %v3077_v25  ;;  %4361 = vmatprep.mubr.msk.f32.mxu0 %vm4847_vm1, %v4836_v23 }
 0x3ee   : > { %3169 = vmatprep.subr.mxu0 %v4247_v26 }
 0x3f0   : > { %4362 = vmatmul.mubr.msk.f32.vlgmr.msra.gmra.mrb[8].mxu0 %vm2330_vm3, %v5773_v54  ;;  %v3568_v54 = vpop.permute.xlu0 %3567 }
 0x3f1   : > { %3233 = vmatprep.mubr.f32.mxu0 %v4836_v23  ;;  %3170 = vmatpush1.msra.mxu0 %v4246_v28 }
 0x3f2   : > { %3243 = vmatprep.subr.mxu0 %v3157_v29 }
 0x3f4   : > { %v3820_v2 = vpop.permute.xlu0 %3819 }
 0x4bf   : > { %v3060_v30 = vpop.f32.mrb[6].mxu0 }
 0x4c0   : > { %v3062_v32 = vpop.f32.mrb[7].mxu0 }
 0x4c1   : > { %v4281_v33 = vpack.c.bf16 %v3062_v32, %v3060_v30 }
 0x4c3   : > { %4244 = vst [vmem:[%s5638_s23 + $0x10] sm:$0xff] %v4281_v33  ;;  %v5820_v27 = vpop.f32.mrb[8].mxu0 }
 0x4c4   : > { %v4363_v35 = vpop.f32.mrb[9].mxu0  ;;  %v3162_v36 = vmul.f32 %v3160_v34, %v5820_v27  ;;  %v3155_v40 = vmul.f32 %v3153_v39, %v5820_v27  ;;  %v3318_v44 = vmul.f32 %v3316_v43, %v5820_v27  ;;  %v3402_v47 = vmul.f32 %v3400_v46, %v5820_v27 }
 0x4c5   : > { %v3486_v51 = vmul.f32 %v3484_v50, %v5820_v27  ;;  %v3570_v55 = vmul.f32 %v3568_v54, %v5820_v27  ;;  %v3654_v59 = vmul.f32 %v3652_v58, %v5820_v27  ;;  %v3738_v63 = vmul.f32 %v3736_v62, %v5820_v27 }
 0x4c6   : > { %4248 = vmatmul.mubr.msk.f32.vlgmr.msra.gmra.mrb[10].mxu0 %vm2330_vm3, %v3162_v36  ;;  %v3822_v3 = vmul.f32 %v3820_v2, %v5820_v27 }
 0x4c7   : > { %3244 = vmatpush1.msra.mxu0 %v3156_v38  ;;  %3307 = vmatprep.mubr.f32.mxu0 %v4836_v23 }
 0x4c8   : > { %3325 = vmatprep.subr.mxu0 %v4251_v0 }
 0x4ca   : > { %v3959_v8 = vld [vmem:[%s5638_s23 + $0x10] sm:$0xff] (%p5933_p6) }
 0x4cb   : > { %3960 = vst [vmem:[%s3921_s22 + $0x20] sm:$0xff] (%p5933_p6), %v3959_v8 }
 0x4ce   : > { %4249 = vmatmul.mubr.msk.f32.vlgmr.msra.gmra.mrb[10].mxu0 %vm2330_vm3, %v3155_v40 }
 0x4cf   : > { %3326 = vmatpush1.msra.mxu0 %v4250_v41  ;;  %3389 = vmatprep.mubr.f32.mxu0 %v4836_v23 }
 0x4d0   : > { %3409 = vmatprep.subr.mxu0 %v4254_v42 }
 0x4d6   : > { %4252 = vmatmul.mubr.msk.f32.vlgmr.msra.gmra.mrb[10].mxu0 %vm2330_vm3, %v3318_v44 }
 0x4d7   : > { %3410 = vmatpush1.msra.mxu0 %v4253_v45  ;;  %3473 = vmatprep.mubr.f32.mxu0 %v4836_v23 }
 0x4d8   : > { %3493 = vmatprep.subr.mxu0 %v4257_v37 }
 0x4de   : > { %4255 = vmatmul.mubr.msk.f32.vlgmr.msra.gmra.mrb[10].mxu0 %vm2330_vm3, %v3402_v47 }
 0x4df   : > { %3494 = vmatpush1.msra.mxu0 %v4256_v48  ;;  %3557 = vmatprep.mubr.f32.mxu0 %v4836_v23 }
 0x4e0   : > { %3577 = vmatprep.subr.mxu0 %v4260_v49 }
 0x4e6   : > { %4258 = vmatmul.mubr.msk.f32.vlgmr.msra.gmra.mrb[10].mxu0 %vm2330_vm3, %v3486_v51 }
 0x4e7   : > { %3578 = vmatpush1.msra.mxu0 %v4259_v52  ;;  %3641 = vmatprep.mubr.f32.mxu0 %v4836_v23 }
 0x4e8   : > { %3661 = vmatprep.subr.mxu0 %v4263_v53 }
 0x4ee   : > { %4261 = vmatmul.mubr.msk.f32.vlgmr.msra.gmra.mrb[10].mxu0 %vm2330_vm3, %v3570_v55 }
 0x4ef   : > { %3662 = vmatpush1.msra.mxu0 %v4262_v56  ;;  %3725 = vmatprep.mubr.f32.mxu0 %v4836_v23 }
 0x4f0   : > { %3745 = vmatprep.subr.mxu0 %v4266_v57 }
 0x4f6   : > { %4264 = vmatmul.mubr.msk.f32.vlgmr.msra.gmra.mrb[10].mxu0 %vm2330_vm3, %v3654_v59 }
 0x4f7   : > { %3746 = vmatpush1.msra.mxu0 %v4265_v60  ;;  %3809 = vmatprep.mubr.f32.mxu0 %v4836_v23 }
 0x4f8   : > { %3829 = vmatprep.subr.mxu0 %v4269_v61 }
 0x4fe   : > { %4267 = vmatmul.mubr.msk.f32.vlgmr.msra.gmra.mrb[10].mxu0 %vm2330_vm3, %v3738_v63 }
 0x4ff   : > { %3830 = vmatpush1.msra.mxu0 %v4268_v1  ;;  %3893 = vmatprep.mubr.f32.mxu0 %v4836_v23  ;;  %v3957_v23 = vld [vmem:[%s5638_s23 + $0x8] sm:$0xff] (%p5933_p6) }
 0x500   : > { %3958 = vst [vmem:[%s3921_s22 + $0x10] sm:$0xff] (%p5933_p6), %v3957_v23 }
 0x506   : > { %4270 = vmatmul.mubr.msk.f32.vlgmr.msra.gmra.mrb[10].mxu0 %vm2330_vm3, %v3822_v3 }
 0x5d7   : > { %3918 = sbr.rel (!%p5933_p6) target bundleno = 1510 (0x5e6), region = 68 }
 0x5d9   : > { %v3895_v4 = vpop.f32.mrb[10].mxu0 }
 0x5da   : > { %v3897_v5 = vpop.f32.mrb[11].mxu0 }
 0x5db   : > { %v4282_v6 = vpack.c.bf16 %v3897_v5, %v3895_v4 }
 0x5dd   : > { %4272 = vst [vmem:[%s5638_s23 + $0x18] sm:$0xff] %v4282_v6 }
 0x5e4   : > { %v3961_v9 = vld [vmem:[%s5638_s23 + $0x18] sm:$0xff] }
 0x5e5   : > { %3962 = vst [vmem:[%s3921_s22 + $0x30] sm:$0xff] %v3961_v9 }
 0x5e6 PF: > { %p18_p7 = scmp.ge.s32.totalorder %s4936_s17, 4   ;;  %s5934_s13 = smov %s4818_s14 }
 0x5e7   : > { %s5935_s14 = smov %s4944_s20  ;;  %s5936_s15 = smov %s4936_s17 }
 0x5e8   :  { %20 = sbr.rel (!%p18_p7) target bundleno = 2 (0x2), region = 171 }
 0x5ef   :  { %3978 = vsyncpa [#allocation3], 1 }
 0x5f0   :  { %3980 = vsyncpa [#allocation3 + $0x1], 1 }

</bundles_post_ra>
